<compile_context>
chip_gen: v5e
topology: v5e:2x2
jax: 0.10.0
libtpu: 0.0.40
codegen_flags: <defaults>
</compile_context>

<pallas_src>
import jax
import jax.numpy as jnp
from jax import lax
from jax.experimental import pallas as pl
from jax.experimental.pallas import tpu as pltpu

EPS = 1e-3


def _fused_bn_relu_conv_kernel(x_ref, gamma_ref, beta_ref, w_ref, o_ref):
    """Single-block kernel: one-pass stats + folded-BN affine + ReLU + 1x1 conv.

    x_ref:     (Cin, M)    f32   channel-major activations (M = N*H*W)
    gamma_ref: (Cin, 1)    f32
    beta_ref:  (Cin, 1)    f32
    w_ref:     (Cout, Cin) f32 or bf16
    o_ref:     (Cout, M)   f32   lane-dense output
    """
    x = x_ref[...]
    inv_m = 1.0 / x.shape[1]

    # One pass over x for both moments.
    s1 = jnp.sum(x, axis=1, keepdims=True)          # (Cin, 1)
    s2 = jnp.sum(x * x, axis=1, keepdims=True)      # (Cin, 1)
    mean = s1 * inv_m
    var = jnp.maximum(s2 * inv_m - mean * mean, 0.0)   # clamp f32 cancellation

    # Fold BN into a single per-channel affine: y = a*x + b.
    a = gamma_ref[...] * lax.rsqrt(var + EPS)       # (Cin, 1)
    b = beta_ref[...] - mean * a                    # (Cin, 1)

    y = jnp.maximum(x * a + b, 0.0)                 # BN + ReLU, 2-3 VPU ops/elem

    # 1x1 conv == (Cout, Cin) @ (Cin, M) on the MXU, f32 accumulation.
    o_ref[...] = jnp.dot(
        w_ref[...], y.astype(w_ref.dtype),
        preferred_element_type=jnp.float32,
    ).astype(o_ref.dtype)


def _affine_relu_conv_kernel(x_ref, a_ref, b_ref, w_ref, o_ref):
    """M-tiled kernel: folded-BN affine + ReLU + matmul on one (Cin, TM) tile."""
    y = jnp.maximum(x_ref[...] * a_ref[...] + b_ref[...], 0.0)
    o_ref[...] = jnp.dot(
        w_ref[...], y.astype(w_ref.dtype),
        preferred_element_type=jnp.float32,
    ).astype(o_ref.dtype)


def bn_relu_conv1x1(x_nchw, gamma, beta, w_oihw, *,
                    use_bf16_matmul=False,
                    tile_m=512,
                    fused_x_bytes_limit=4 * 1024 * 1024):
    """BatchNorm2d (batch stats) -> ReLU -> Conv2d 1x1 (no bias).

    x_nchw: (N, Cin, H, W); gamma/beta: (Cin,); w_oihw: (Cout, Cin, 1, 1).
    Returns (N, Cout, H, W) float32.
    """
    N, Cin, H, W = x_nchw.shape
    Cout = w_oihw.shape[0]
    M = N * H * W

    # Channel-major (Cin, M).  For N == 1 this is a pure reshape (no HBM traffic).
    if N == 1:
        x_cm = x_nchw.reshape(Cin, M)
    else:
        x_cm = jnp.transpose(x_nchw.reshape(N, Cin, H * W), (1, 0, 2)).reshape(Cin, M)
    x_cm = x_cm.astype(jnp.float32)

    w_mat = w_oihw.reshape(Cout, Cin).astype(jnp.float32)
    if use_bf16_matmul:
        w_mat = w_mat.astype(jnp.bfloat16)
    gamma2 = gamma.reshape(Cin, 1).astype(jnp.float32)
    beta2 = beta.reshape(Cin, 1).astype(jnp.float32)

    if Cin * M * 4 <= fused_x_bytes_limit:
        # Small case (the module's shape): fully fused, whole arrays in VMEM,
        # x is read from HBM exactly once.
        out_cm = pl.pallas_call(
            _fused_bn_relu_conv_kernel,
            out_shape=jax.ShapeDtypeStruct((Cout, M), jnp.float32),
            in_specs=[
                pl.BlockSpec(memory_space=pltpu.MemorySpace.VMEM),  # x (Cin, M)
                pl.BlockSpec(memory_space=pltpu.MemorySpace.VMEM),  # gamma (Cin, 1)
                pl.BlockSpec(memory_space=pltpu.MemorySpace.VMEM),  # beta  (Cin, 1)
                pl.BlockSpec(memory_space=pltpu.MemorySpace.VMEM),  # W (Cout, Cin)
            ],
            out_specs=pl.BlockSpec(memory_space=pltpu.MemorySpace.VMEM),
        )(x_cm, gamma2, beta2, w_mat)
    else:
        # Large M: hoist the batch statistics (single fused XLA reduction over x),
        # fold BN into (a, b), then run a pipelined, megacore-parallel M-tiled grid.
        mean = jnp.mean(x_cm, axis=1, keepdims=True)                      # (Cin, 1)
        var = jnp.maximum(
            jnp.mean(x_cm * x_cm, axis=1, keepdims=True) - mean * mean, 0.0)
        a_vec = gamma2 * lax.rsqrt(var + EPS)
        b_vec = beta2 - mean * a_vec

        grid_m = pl.cdiv(M, tile_m)
        out_cm = pl.pallas_call(
            _affine_relu_conv_kernel,
            out_shape=jax.ShapeDtypeStruct((Cout, M), jnp.float32),
            grid=(grid_m,),
            in_specs=[
                pl.BlockSpec((Cin, tile_m), lambda i: (0, i)),   # x tile
                pl.BlockSpec((Cin, 1), lambda i: (0, 0)),        # a (resident)
                pl.BlockSpec((Cin, 1), lambda i: (0, 0)),        # b (resident)
                pl.BlockSpec((Cout, Cin), lambda i: (0, 0)),     # W (resident)
            ],
            out_specs=pl.BlockSpec((Cout, tile_m), lambda i: (0, i)),
            compiler_params=pltpu.CompilerParams(
                dimension_semantics=("parallel",)),
        )(x_cm, a_vec, b_vec, w_mat)

    # (Cout, M) -> (N, Cout, H, W).  Free reshape for N == 1.
    if N == 1:
        return out_cm.reshape(1, Cout, H, W)
    return jnp.transpose(out_cm.reshape(Cout, N, H, W), (1, 0, 2, 3))


def _reference(x_nchw, gamma, beta, w_oihw):
    # Pure-JAX reference (training-mode BN, biased variance).
    mean = jnp.mean(x_nchw, axis=(0, 2, 3), keepdims=True)
    var = jnp.mean((x_nchw - mean) ** 2, axis=(0, 2, 3), keepdims=True)
    xh = (x_nchw - mean) * lax.rsqrt(var + EPS)
    y = xh * gamma.reshape(1, -1, 1, 1) + beta.reshape(1, -1, 1, 1)
    y = jnp.maximum(y, 0.0)
    w = w_oihw.reshape(w_oihw.shape[0], w_oihw.shape[1])      # (Cout, Cin)
    return jnp.einsum("nchw,oc->nohw", y, w)


if __name__ == "__main__":
    key = jax.random.PRNGKey(0)
    k_x, k_g, k_b, k_w = jax.random.split(key, 4)

    N, Cin, H, W, Cout = 1, 88, 28, 28, 24

    x = jax.random.normal(k_x, (N, Cin, H, W), dtype=jnp.float32)
    gamma = 1.0 + 0.1 * jax.random.normal(k_g, (Cin,), dtype=jnp.float32)
    beta = 0.1 * jax.random.normal(k_b, (Cin,), dtype=jnp.float32)
    w = jax.random.normal(k_w, (Cout, Cin, 1, 1), dtype=jnp.float32) * 0.05

    ref = _reference(x, gamma, beta, w)

    # 1) Default path: fused single-block channel-major kernel (f32 matmul).
    out = jax.block_until_ready(bn_relu_conv1x1(x, gamma, beta, w))
    assert out.shape == (N, Cout, H, W)
    assert jnp.allclose(out, ref, atol=1e-3, rtol=1e-3), (
        "fused max err", float(jnp.max(jnp.abs(out - ref))))

    # 2) Forced M-tiled grid path (stats hoisted, 'parallel' grid axis).
    out_tiled = jax.block_until_ready(
        bn_relu_conv1x1(x, gamma, beta, w, tile_m=256, fused_x_bytes_limit=0))
    assert jnp.allclose(out_tiled, ref, atol=1e-3, rtol=1e-3), (
        "tiled max err", float(jnp.max(jnp.abs(out_tiled - ref))))

    # 3) bf16 MXU-input fast path (v6e/v7x); looser tolerance by construction.
    out_bf16 = jax.block_until_ready(
        bn_relu_conv1x1(x, gamma, beta, w, use_bf16_matmul=True))
    assert jnp.allclose(out_bf16, ref, atol=2e-2, rtol=2e-2), (
        "bf16 max err", float(jnp.max(jnp.abs(out_bf16 - ref))))

    print("KERNEL_OK")
</pallas_src>

<mosaic_0001>
module attributes {stable_mosaic.version = 11 : i64} {
  func.func @_fused_bn_relu_conv_kernel(%arg0: memref<88x784xf32, #tpu.memory_space<vmem>>, %arg1: memref<88x1xf32, #tpu.memory_space<vmem>>, %arg2: memref<88x1xf32, #tpu.memory_space<vmem>>, %arg3: memref<24x88xf32, #tpu.memory_space<vmem>>, %arg4: memref<24x784xf32, #tpu.memory_space<vmem>>) attributes {dimension_semantics = [], scalar_prefetch = 0 : i64, scratch_operands = 0 : i64, tpu.core_type = #tpu.core_type<tc>} {
    %c0 = arith.constant 0 : index
    %c0_0 = arith.constant 0 : index
    %0 = vector.load %arg0[%c0, %c0_0] : memref<88x784xf32, #tpu.memory_space<vmem>>, vector<88x784xf32>
    %cst = arith.constant dense<0.000000e+00> : vector<88xf32>
    %1 = vector.multi_reduction <add>, %0, %cst [1] : vector<88x784xf32> to vector<88xf32>
    %2 = vector.shape_cast %1 : vector<88xf32> to vector<88x1xf32>
    %3 = arith.mulf %0, %0 : vector<88x784xf32>
    %cst_1 = arith.constant dense<0.000000e+00> : vector<88xf32>
    %4 = vector.multi_reduction <add>, %3, %cst_1 [1] : vector<88x784xf32> to vector<88xf32>
    %5 = vector.shape_cast %4 : vector<88xf32> to vector<88x1xf32>
    %cst_2 = arith.constant 0.00127551018 : f32
    %6 = vector.broadcast %cst_2 : f32 to vector<88x1xf32>
    %7 = arith.mulf %2, %6 : vector<88x1xf32>
    %cst_3 = arith.constant 0.00127551018 : f32
    %8 = vector.broadcast %cst_3 : f32 to vector<88x1xf32>
    %9 = arith.mulf %5, %8 : vector<88x1xf32>
    %10 = arith.mulf %7, %7 : vector<88x1xf32>
    %11 = arith.subf %9, %10 : vector<88x1xf32>
    %cst_4 = arith.constant 0.000000e+00 : f32
    %12 = vector.broadcast %cst_4 : f32 to vector<88x1xf32>
    %13 = arith.maximumf %11, %12 : vector<88x1xf32>
    %c0_5 = arith.constant 0 : index
    %c0_6 = arith.constant 0 : index
    %14 = vector.load %arg1[%c0_5, %c0_6] : memref<88x1xf32, #tpu.memory_space<vmem>>, vector<88x1xf32>
    %cst_7 = arith.constant 1.000000e-03 : f32
    %15 = vector.broadcast %cst_7 : f32 to vector<88x1xf32>
    %16 = arith.addf %13, %15 : vector<88x1xf32>
    %17 = math.rsqrt %16 : vector<88x1xf32>
    %18 = arith.mulf %14, %17 : vector<88x1xf32>
    %c0_8 = arith.constant 0 : index
    %c0_9 = arith.constant 0 : index
    %19 = vector.load %arg2[%c0_8, %c0_9] : memref<88x1xf32, #tpu.memory_space<vmem>>, vector<88x1xf32>
    %20 = arith.mulf %7, %18 : vector<88x1xf32>
    %21 = arith.subf %19, %20 : vector<88x1xf32>
    %22 = vector.broadcast %18 : vector<88x1xf32> to vector<88x784xf32>
    %23 = arith.mulf %0, %22 : vector<88x784xf32>
    %24 = vector.broadcast %21 : vector<88x1xf32> to vector<88x784xf32>
    %25 = arith.addf %23, %24 : vector<88x784xf32>
    %cst_10 = arith.constant 0.000000e+00 : f32
    %26 = vector.broadcast %cst_10 : f32 to vector<88x784xf32>
    %27 = arith.maximumf %25, %26 : vector<88x784xf32>
    %c0_11 = arith.constant 0 : index
    %c0_12 = arith.constant 0 : index
    %28 = vector.load %arg3[%c0_11, %c0_12] : memref<24x88xf32, #tpu.memory_space<vmem>>, vector<24x88xf32>
    %cst_13 = arith.constant dense<0.000000e+00> : vector<24x784xf32>
    %29 = tpu.matmul %28, %27, %cst_13 {dimension_numbers = #tpu.dot_dimension_numbers<[1], [0], [0], [1], [0, 0, 1, 1], [], []>} : vector<24x88xf32>, vector<88x784xf32>, vector<24x784xf32> -> vector<24x784xf32>
    %c0_14 = arith.constant 0 : index
    %c0_15 = arith.constant 0 : index
    %30 = vector.load %arg4[%c0_14, %c0_15] : memref<24x784xf32, #tpu.memory_space<vmem>>, vector<24x784xf32>
    tpu.vector_store %arg4[%c0_14, %c0_15], %29 {strides = array<i32>} : memref<24x784xf32, #tpu.memory_space<vmem>>, vector<24x784xf32>,
    return
  }
}

</mosaic_0001>

<bundles_post_ra>
// kernel: tpu_custom_call.1
= control target key start
LH: loop header
LB: loop body
LE: loop exit
PB: predicated region body
PF: predicated region fallthrough
CT: control target
= control target key end

     0   :  { %9 = vsyncpa [#allocation3], 0  ;;  %s2051_s0 = inlined_call_operand.hbm [shape: f32[88,784], index: 0, kind: input, shape index: {}]   ;;  %s2052_s1 = inlined_call_operand.vmem [shape: f32[88,1], index: 1, kind: input, shape index: {}]   ;;  %s2053_s2 = inlined_call_operand.vmem [shape: f32[88,1], index: 2, kind: input, shape index: {}]   ;;  %s2054_s3 = inlined_call_operand.vmem [shape: f32[24,88], index: 3, kind: input, shape index: {}]   ;;  %s2055_s4 = inlined_call_operand.hbm [shape: f32[24,784], index: 4, kind: output, shape index: {}]  }
   0x1   :  { %10 = vsyncpa [#allocation4], 0  ;;  %s15_s17 = sshll.u32 %s2051_s0, 4  ;;  %s1379_s18 = smov [#allocation2]   ;;  %s16_s17 = int_to_ptr.hbm [resolvable:$true] %s15_s17 }
   0x2   :  { %s17_s19 = sshll.u32 %s1379_s18, 4  ;;  %s1380_s20 = smov 896   ;;  %s18_s19 = int_to_ptr.vmem [resolvable:$true] %s17_s19 }
   0x3   :  { %s1381_s21 = smov 56  }
   0x4   :  { %23 = dma.hbm_to_vmem [thread:$0]  %s16_s17, 9856, %s18_s19, [#allocation3], %s1380_s20, %s1380_s20, %s1381_s21  }
   0x5   :  { %1375 = dma.done.wait [#allocation3], 9856  }
   0x6   :  { %1376 = vsyncadd [#allocation3], 4294957440  ;;  %v104_v0 = vld [vmem:[#allocation2 + $0x230] sm:$0xff]  ;;  %v105_v1 = vld [vmem:[#allocation2 + $0x238] sm:$0xff]  ;;  %vm116_vm0 = vcmask 130048   ;;  %s1181_s22 = sshll.u32 %s2055_s4, 4  ;;  %s1182_s22 = int_to_ptr.hbm [resolvable:$true] %s1181_s22 }
   0x7   :  { %v106_v2 = vld [vmem:[#allocation2 + $0x240] sm:$0xff]  ;;  %v107_v3 = vld [vmem:[#allocation2 + $0x248] sm:$0xff]  ;;  %v202_v4 = vadd.f32 %v105_v1, %v104_v0  ;;  %v1417_v8 = vmul.f32 %v104_v0, %v104_v0  ;;  %v1419_v9 = vmul.f32 %v105_v1, %v105_v1  ;;  %v108_v10 = vld [vmem:[#allocation2 + $0x250] sm:$0xff] }
   0x8   :  { %v1415_v5 = vld [vmem:[#allocation2 + $0x260] sm:$0xff]  ;;  %v91_v7 = vld [vmem:[#allocation2 + $0x1c8] sm:$0xff]  ;;  %v92_v12 = vld [vmem:[#allocation2 + $0x1d0] sm:$0xff]  ;;  %v1421_v16 = vmul.f32 %v106_v2, %v106_v2  ;;  %v1425_v22 = vmul.f32 %v107_v3, %v107_v3  ;;  %v1427_v23 = vmul.f32 %v108_v10, %v108_v10 }
   0x9   :  { %v90_v6 = vld [vmem:[#allocation2 + $0x1c0] sm:$0xff]  ;;  %v203_v11 = vadd.f32 %v202_v4, %v106_v2  ;;  %v93_v13 = vld [vmem:[#allocation2 + $0x1d8] sm:$0xff]  ;;  %v207_v17 = vsel %vm116_vm0, %v1415_v5, 0.0  ;;  %v96_v19 = vld [vmem:[#allocation2 + $0x1f0] sm:$0xff]  ;;  %v268_v21 = vmul.f32 %v91_v7, %v91_v7  ;;  %v269_v29 = vmul.f32 %v92_v12, %v92_v12 }
   0xa   :  { %v184_v14 = vadd.f32 %v91_v7, %v90_v6  ;;  %v267_v15 = vmul.f32 %v90_v6, %v90_v6  ;;  %v94_v18 = vld [vmem:[#allocation2 + $0x1e0] sm:$0xff]  ;;  %v83_v20 = vld [vmem:[#allocation2 + $0x188] sm:$0xff]  ;;  %v84_v27 = vld [vmem:[#allocation2 + $0x190] sm:$0xff]  ;;  %v270_v30 = vmul.f32 %v93_v13, %v93_v13  ;;  %v189_v32 = vsel %vm116_vm0, %v96_v19, 0.0 }
   0xb   :  { %v204_v24 = vadd.f32 %v203_v11, %v107_v3  ;;  %v95_v25 = vld [vmem:[#allocation2 + $0x1e8] sm:$0xff]  ;;  %v85_v28 = vld [vmem:[#allocation2 + $0x198] sm:$0xff]  ;;  %v1432_v33 = vld [vmem:[#allocation2 + $0x1a0] sm:$0xff]  ;;  %v175_v35 = vadd.f32 %v84_v27, %v83_v20  ;;  %v271_v36 = vmul.f32 %v94_v18, %v94_v18  ;;  %v273_v43 = vmul.f32 %v96_v19, %v96_v19 }
   0xc   :  { %v185_v26 = vadd.f32 %v184_v14, %v92_v12  ;;  %v1429_v31 = vld [vmem:[#allocation2 + $0x258] sm:$0xff]  ;;  %v1436_v37 = vmul.f32 %v95_v25, %v95_v25  ;;  %v98_v41 = vld [vmem:[#allocation2 + $0x200] sm:$0xff]  ;;  %v99_v42 = vld [vmem:[#allocation2 + $0x208] sm:$0xff]  ;;  %v360_v44 = vadd.f32 %v268_v21, %v267_v15  ;;  %v260_v57 = vmul.f32 %v83_v20, %v83_v20 }
   0xd   :  { %v1434_v34 = vld [vmem:[#allocation2 + $0x1b8] sm:$0xff]  ;;  %v205_v38 = vadd.f32 %v204_v24, %v108_v10  ;;  %v87_v45 = vld [vmem:[#allocation2 + $0x1a8] sm:$0xff]  ;;  %v176_v46 = vadd.f32 %v175_v35, %v85_v28  ;;  %v100_v47 = vld [vmem:[#allocation2 + $0x210] sm:$0xff]  ;;  %v275_v50 = vmul.f32 %v98_v41, %v98_v41  ;;  %v276_v61 = vmul.f32 %v99_v42, %v99_v42 }
   0xe   :  { %v186_v39 = vadd.f32 %v185_v26, %v93_v13  ;;  %v97_v40 = vld [vmem:[#allocation2 + $0x1f8] sm:$0xff]  ;;  %v180_v53 = vsel %vm116_vm0, %v1434_v34, 0.0  ;;  %v103_v54 = vld [vmem:[#allocation2 + $0x228] sm:$0xff]  ;;  %v76_v55 = vld [vmem:[#allocation2 + $0x150] sm:$0xff]  ;;  %v261_v62 = vmul.f32 %v84_v27, %v84_v27  ;;  %v277_v2 = vmul.f32 %v100_v47, %v100_v47 }
   0xf   :  { %v193_v48 = vadd.f32 %v98_v41, %v97_v40  ;;  %v274_v49 = vmul.f32 %v97_v40, %v97_v40  ;;  %v206_v51 = vadd.f32 %v205_v38, %v1429_v31  ;;  %v77_v56 = vld [vmem:[#allocation2 + $0x158] sm:$0xff]  ;;  %v177_v58 = vadd.f32 %v176_v46, %v1432_v33  ;;  %v88_v1 = vld [vmem:[#allocation2 + $0x1b0] sm:$0xff]  ;;  %v78_v4 = vld [vmem:[#allocation2 + $0x160] sm:$0xff] }
  0x10   :  { %v187_v52 = vadd.f32 %v186_v39, %v94_v18  ;;  %v101_v59 = vld [vmem:[#allocation2 + $0x218] sm:$0xff]  ;;  %v280_v3 = vmul.f32 %v103_v54, %v103_v54  ;;  %v102_v7 = vld [vmem:[#allocation2 + $0x220] sm:$0xff]  ;;  %v166_v12 = vadd.f32 %v77_v56, %v76_v55  ;;  %v198_v14 = vsel %vm116_vm0, %v103_v54, 0.0  ;;  %v79_v18 = vld [vmem:[#allocation2 + $0x168] sm:$0xff] }
  0x11   :  { %v194_v60 = vadd.f32 %v193_v48, %v99_v42  ;;  %v208_v63 = vadd.f32 %v207_v17, %v206_v51  ;;  %v178_v6 = vadd.f32 %v177_v58, %v87_v45  ;;  %v369_v11 = vadd.f32 %v275_v50, %v274_v49  ;;  %v1443_v24 = vld [vmem:[#allocation2 + $0x180] sm:$0xff]  ;;  %v80_v35 = vld [vmem:[#allocation2 + $0x170] sm:$0xff]  ;;  %v81_v46 = vld [vmem:[#allocation2 + $0x178] sm:$0xff] }
  0x12   :  { %v188_v0 = vadd.f32 %v187_v52, %v95_v25  ;;  %v278_v15 = vmul.f32 %v101_v59, %v101_v59  ;;  %v361_v19 = vadd.f32 %v360_v44, %v269_v29  ;;  %v167_v25 = vadd.f32 %v166_v12, %v78_v4 }
  0x13   :  { %v195_v10 = vadd.f32 %v194_v60, %v100_v47  ;;  %209 = vadd.xlane.f32.xlu0 %v208_v63  ;;  %v179_v20 = vadd.f32 %v178_v6, %v88_v1  ;;  %v370_v17 = vadd.f32 %v369_v11, %v276_v61  ;;  %v279_v26 = vmul.f32 %v102_v7, %v102_v7 }
  0x14   :  { %v190_v13 = vadd.f32 %v189_v32, %v188_v0  ;;  %v374_v27 = vsel %vm116_vm0, %v280_v3, 0.0  ;;  %v362_v38 = vadd.f32 %v361_v19, %v270_v30  ;;  %v262_v39 = vmul.f32 %v85_v28, %v85_v28 }
  0x15   :  { %v196_v21 = vadd.f32 %v195_v10, %v101_v59  ;;  %v181_v40 = vadd.f32 %v180_v53, %v179_v20  ;;  %v371_v41 = vadd.f32 %v370_v17, %v277_v2  ;;  %v168_v42 = vadd.f32 %v167_v25, %v79_v18  ;;  %v62_v2 = vld [vmem:[#allocation2 + $0xe0] sm:$0xff]  ;;  %v64_v10 = vld [vmem:[#allocation2 + $0xf0] sm:$0xff]  ;;  %v73_v25 = vld [vmem:[#allocation2 + $0x138] sm:$0xff] }
  0x16   :  { %191 = vadd.xlane.f32.xlu1 %v190_v13  ;;  %v171_v29 = vsel %vm116_vm0, %v1443_v24, 0.0  ;;  %v363_v44 = vadd.f32 %v362_v38, %v271_v36  ;;  %v365_v47 = vsel %vm116_vm0, %v273_v43, 0.0  ;;  %v263_v48 = vmul.f32 %v1432_v33, %v1432_v33  ;;  %v72_v13 = vld [vmem:[#allocation2 + $0x130] sm:$0xff] }
  0x17   :  { %v197_v32 = vadd.f32 %v196_v21, %v102_v7  ;;  %182 = vadd.xlane.f32.xlu2 %v181_v40  ;;  %v372_v50 = vadd.f32 %v371_v41, %v278_v15  ;;  %v169_v51 = vadd.f32 %v168_v42, %v80_v35  ;;  %v351_v30 = vadd.f32 %v261_v62, %v260_v57  ;;  %v65_v21 = vld [vmem:[#allocation2 + $0xf8] sm:$0xff]  ;;  %v66_v40 = vld [vmem:[#allocation2 + $0x100] sm:$0xff] }
  0x18   :  { %v364_v28 = vadd.f32 %v363_v44, %v1436_v37  ;;  %v264_v52 = vmul.f32 %v87_v45, %v87_v45  ;;  %v266_v53 = vmul.f32 %v1434_v34, %v1434_v34  ;;  %v378_v54 = vadd.f32 %v1419_v9, %v1417_v8  ;;  %v69_v37 = vld [vmem:[#allocation2 + $0x118] sm:$0xff]  ;;  %v70_v45 = vld [vmem:[#allocation2 + $0x120] sm:$0xff]  ;;  %v63_v8 = vld [vmem:[#allocation2 + $0xe8] sm:$0xff] }
  0x19   :  { %v199_v49 = vadd.f32 %v198_v14, %v197_v32  ;;  %v373_v36 = vadd.f32 %v372_v50, %v279_v26  ;;  %v170_v58 = vadd.f32 %v169_v51, %v81_v46  ;;  %v352_v43 = vadd.f32 %v351_v30, %v262_v39  ;;  %v75_v14 = vld [vmem:[#allocation2 + $0x148] sm:$0xff]  ;;  %v74_v42 = vld [vmem:[#allocation2 + $0x140] sm:$0xff] }
  0x1a   :  { %v253_v59 = vmul.f32 %v76_v55, %v76_v55  ;;  %v265_v33 = vmul.f32 %v88_v1, %v88_v1  ;;  %v287_v60 = vmul.f32 %v1415_v5, %v1415_v5  ;;  %v379_v57 = vadd.f32 %v378_v54, %v1421_v16  ;;  %v71_v5 = vld [vmem:[#allocation2 + $0x128] sm:$0xff] }
  0x1b   :  { %200 = vadd.xlane.f32.xlu0 %v199_v49  ;;  %v254_v61 = vmul.f32 %v77_v56, %v77_v56  ;;  %v375_v62 = vadd.f32 %v374_v27, %v373_v36  ;;  %v172_v63 = vadd.f32 %v171_v29, %v170_v58  ;;  %v353_v34 = vadd.f32 %v352_v43, %v263_v48  ;;  %v67_v51 = vld [vmem:[#allocation2 + $0x108] sm:$0xff] }
  0x1c   :  { %v255_v0 = vmul.f32 %v78_v4, %v78_v4  ;;  %v366_v9 = vadd.f32 %v365_v47, %v364_v28  ;;  %v356_v3 = vsel %vm116_vm0, %v266_v53, 0.0  ;;  %v286_v55 = vmul.f32 %v1429_v31, %v1429_v31  ;;  %v55_v43 = vld [vmem:[#allocation2 + $0xa8] sm:$0xff] }
  0x1d   :  { %v380_v1 = vadd.f32 %v379_v57, %v1425_v22  ;;  %v354_v16 = vadd.f32 %v353_v34, %v264_v52  ;;  %v256_v56 = vmul.f32 %v79_v18, %v79_v18  ;;  %v342_v6 = vadd.f32 %v254_v61, %v253_v59  ;;  %v56_v59 = vld [vmem:[#allocation2 + $0xb0] sm:$0xff] }
  0x1e   :  { %173 = vadd.xlane.f32.xlu1 %v172_v63  ;;  %v157_v7 = vadd.f32 %v70_v45, %v69_v37  ;;  %v383_v4 = vsel %vm116_vm0, %v287_v60, 0.0  ;;  %v257_v12 = vmul.f32 %v80_v35, %v80_v35  ;;  %v148_v15 = vadd.f32 %v63_v8, %v62_v2 }
  0x1f   :  { %v381_v11 = vadd.f32 %v380_v1, %v1427_v23  ;;  %376 = vadd.xlane.f32.xlu2 %v375_v62  ;;  %v355_v19 = vadd.f32 %v354_v16, %v265_v33  ;;  %v258_v31 = vmul.f32 %v81_v46, %v81_v46  ;;  %v343_v20 = vadd.f32 %v342_v6, %v255_v0  ;;  %v68_v46 = vld [vmem:[#allocation2 + $0x110] sm:$0xff]  ;;  %v50_v16 = vld [vmem:[#allocation2 + $0x80] sm:$0xff] }
  0x20   :  { %v158_v22 = vadd.f32 %v157_v7, %v71_v5  ;;  %v149_v18 = vadd.f32 %v148_v15, %v64_v10  ;;  %v246_v26 = vmul.f32 %v69_v37, %v69_v37  ;;  %v247_v27 = vmul.f32 %v70_v45, %v70_v45  ;;  %v48_v37 = vld [vmem:[#allocation2 + $0x70] sm:$0xff]  ;;  %v49_v45 = vld [vmem:[#allocation2 + $0x78] sm:$0xff]  ;;  %v51_v15 = vld [vmem:[#allocation2 + $0x88] sm:$0xff] }
  0x21   :  { %v382_v17 = vadd.f32 %v381_v11, %v286_v55  ;;  %v259_v23 = vmul.f32 %v1443_v24, %v1443_v24  ;;  %v344_v38 = vadd.f32 %v343_v20, %v256_v56  ;;  %v162_v35 = vsel %vm116_vm0, %v75_v14, 0.0  ;;  %v59_v20 = vld [vmem:[#allocation2 + $0xc8] sm:$0xff] }
  0x22   :  { %v159_v39 = vadd.f32 %v158_v22, %v72_v13  ;;  %v357_v32 = vadd.f32 %v356_v3, %v355_v19  ;;  %v150_v29 = vadd.f32 %v149_v18, %v65_v21  ;;  %v248_v44 = vmul.f32 %v71_v5, %v71_v5 }
  0x23   :  { %367 = vadd.xlane.f32.xlu0 %v366_v9  ;;  %v384_v41 = vadd.f32 %v383_v4, %v382_v17  ;;  %v345_v47 = vadd.f32 %v344_v38, %v257_v12  ;;  %v249_v49 = vmul.f32 %v72_v13, %v72_v13  ;;  %v252_v50 = vmul.f32 %v75_v14, %v75_v14  ;;  %v1475_v9 = vld [vmem:[#allocation2 + $0x40] sm:$0xff]  ;;  %v43_v4 = vld [vmem:[#allocation2 + $0x48] sm:$0xff]  ;;  %v52_v38 = vld [vmem:[#allocation2 + $0x90] sm:$0xff] }
  0x24   :  { %v160_v48 = vadd.f32 %v159_v39, %v73_v25  ;;  %v151_v30 = vadd.f32 %v150_v29, %v66_v40  ;;  %v333_v28 = vadd.f32 %v247_v27, %v246_v26  ;;  %v239_v24 = vmul.f32 %v62_v2, %v62_v2  ;;  %v1471_v2 = vld [vmem:[#allocation2 + $0xb8] sm:$0xff] }
  0x25   :  { %v240_v52 = vmul.f32 %v63_v8, %v63_v8  ;;  %v346_v53 = vadd.f32 %v345_v47, %v258_v31  ;;  %v347_v54 = vsel %vm116_vm0, %v259_v23, 0.0  ;;  %v153_v58 = vsel %vm116_vm0, %v68_v46, 0.0  ;;  %v1473_v8 = vld [vmem:[#allocation2 + $0x38] sm:$0xff] }
  0x26   :  { %385 = vadd.xlane.f32.xlu1 %v384_v41  ;;  %v161_v36 = vadd.f32 %v160_v48, %v74_v42  ;;  %v250_v33 = vmul.f32 %v73_v25, %v73_v25  ;;  %v251_v60 = vmul.f32 %v74_v42, %v74_v42  ;;  %v334_v57 = vadd.f32 %v333_v28, %v248_v44  ;;  %v61_v27 = vld [vmem:[#allocation2 + $0xd8] sm:$0xff] }
  0x27   :  { %v241_v61 = vmul.f32 %v64_v10, %v64_v10  ;;  %358 = vadd.xlane.f32.xlu2 %v357_v32  ;;  %v152_v63 = vadd.f32 %v151_v30, %v67_v51  ;;  %v338_v34 = vsel %vm116_vm0, %v252_v50, 0.0  ;;  %v242_v0 = vmul.f32 %v65_v21, %v65_v21  ;;  %v1477_v10 = vld [vmem:[#allocation2 + $0xc0] sm:$0xff]  ;;  %v44_v21 = vld [vmem:[#allocation2 + $0x50] sm:$0xff]  ;;  %v53_v48 = vld [vmem:[#allocation2 + $0x98] sm:$0xff] }
  0x28   :  { %v163_v62 = vadd.f32 %v162_v35, %v161_v36  ;;  %v335_v3 = vadd.f32 %v334_v57, %v249_v49  ;;  %v243_v55 = vmul.f32 %v66_v40, %v66_v40  ;;  %v324_v1 = vadd.f32 %v240_v52, %v239_v24  ;;  %v60_v40 = vld [vmem:[#allocation2 + $0xd0] sm:$0xff]  ;;  %v45_v50 = vld [vmem:[#allocation2 + $0x58] sm:$0xff]  ;;  %v54_v52 = vld [vmem:[#allocation2 + $0xa0] sm:$0xff] }
  0x29   :  { %v139_v5 = vadd.f32 %v56_v59, %v55_v43  ;;  %v348_v56 = vadd.f32 %v347_v54, %v346_v53  ;;  %v244_v6 = vmul.f32 %v67_v51, %v67_v51  ;;  %v245_v7 = vmul.f32 %v68_v46, %v68_v46  ;;  %v47_v36 = vld [vmem:[#allocation2 + $0x68] sm:$0xff] }
  0x2a   :  { %v130_v11 = vadd.f32 %v49_v45, %v48_v37  ;;  %v336_v12 = vadd.f32 %v335_v3, %v250_v33  ;;  %v325_v13 = vadd.f32 %v324_v1, %v241_v61  ;;  %v121_v19 = vadd.f32 %v1475_v9, %v1473_v8 }
  0x2b   :  { %164 = vadd.xlane.f32.xlu0 %v163_v62  ;;  %v140_v14 = vadd.f32 %v139_v5, %v1471_v2  ;;  %v154_v31 = vadd.f32 %v153_v58, %v152_v63  ;;  %v232_v17 = vmul.f32 %v55_v43, %v55_v43  ;;  %v233_v25 = vmul.f32 %v56_v59, %v56_v59 }
  0x2c   :  { %v131_v22 = vadd.f32 %v130_v11, %v50_v16  ;;  %v337_v18 = vadd.f32 %v336_v12, %v251_v60  ;;  %v326_v26 = vadd.f32 %v325_v13, %v242_v0  ;;  %v122_v39 = vadd.f32 %v121_v19, %v43_v4  ;;  %v1498_v11 = vld [vmem:[#allocation2 + $0x8] sm:$0xff] }
  0x2d   :  { %v141_v23 = vadd.f32 %v140_v14, %v1477_v10  ;;  %v329_v35 = vsel %vm116_vm0, %v245_v7, 0.0  ;;  %v234_v41 = vmul.f32 %v1471_v2, %v1471_v2  ;;  %v144_v47 = vsel %vm116_vm0, %v61_v27, 0.0  ;;  %v1496_v7 = vld [vmem:[#allocation2] sm:$0xff] }
  0x2e   :  { %349 = vadd.xlane.f32.xlu1 %v348_v56  ;;  %v132_v32 = vadd.f32 %v131_v22, %v51_v15  ;;  %v339_v42 = vadd.f32 %v338_v34, %v337_v18  ;;  %v327_v46 = vadd.f32 %v326_v26, %v243_v55  ;;  %v123_v44 = vadd.f32 %v122_v39, %v44_v21  ;;  %v46_v34 = vld [vmem:[#allocation2 + $0x60] sm:$0xff] }
  0x2f   :  { %v142_v29 = vadd.f32 %v141_v23, %v59_v20  ;;  %155 = vadd.xlane.f32.xlu2 %v154_v31  ;;  %v235_v51 = vmul.f32 %v1477_v10, %v1477_v10  ;;  %v315_v30 = vadd.f32 %v233_v25, %v232_v17  ;;  %v238_v53 = vmul.f32 %v61_v27, %v61_v27  ;;  %v1500_v17 = vld [vmem:[#allocation2 + $0x10] sm:$0xff]  ;;  %v1506_v23 = vld [vmem:[#allocation2 + $0x18] sm:$0xff] }
  0x30   :  { %v133_v49 = vadd.f32 %v132_v32, %v52_v38  ;;  %v328_v28 = vadd.f32 %v327_v46, %v244_v6  ;;  %v225_v54 = vmul.f32 %v48_v37, %v48_v37  ;;  %v236_v58 = vmul.f32 %v59_v20, %v59_v20 }
  0x31   :  { %v143_v24 = vadd.f32 %v142_v29, %v60_v40  ;;  %v316_v43 = vadd.f32 %v315_v30, %v234_v41  ;;  %v226_v59 = vmul.f32 %v49_v45, %v49_v45  ;;  %v124_v57 = vadd.f32 %v123_v44, %v45_v50  ;;  %v38_v29 = vld [vmem:[#allocation2 + $0x20] sm:$0xff]  ;;  %v39_v30 = vld [vmem:[#allocation2 + $0x28] sm:$0xff] }
  0x32   :  { %v134_v60 = vadd.f32 %v133_v49, %v53_v48  ;;  %v227_v61 = vmul.f32 %v50_v16, %v50_v16  ;;  %v330_v62 = vadd.f32 %v329_v35, %v328_v28  ;;  %v135_v63 = vsel %vm116_vm0, %v54_v52, 0.0 }
  0x33   :  { %340 = vadd.xlane.f32.xlu0 %v339_v42  ;;  %v145_v33 = vadd.f32 %v144_v47, %v143_v24  ;;  %v237_v0 = vmul.f32 %v60_v40, %v60_v40  ;;  %v317_v3 = vadd.f32 %v316_v43, %v235_v51  ;;  %v126_v55 = vsel %vm116_vm0, %v47_v36, 0.0  ;;  %v40_v47 = vld [vmem:[#allocation2 + $0x30] sm:$0xff] }
  0x34   :  { %v320_v1 = vsel %vm116_vm0, %v238_v53, 0.0  ;;  %v228_v37 = vmul.f32 %v51_v15, %v51_v15  ;;  %v306_v5 = vadd.f32 %v226_v59, %v225_v54  ;;  %v218_v45 = vmul.f32 %v1473_v8, %v1473_v8 }
  0x35   :  { %v318_v56 = vadd.f32 %v317_v3, %v236_v58  ;;  %v219_v16 = vmul.f32 %v1475_v9, %v1475_v9  ;;  %v220_v6 = vmul.f32 %v43_v4, %v43_v4  ;;  %v136_v12 = vadd.f32 %v135_v63, %v134_v60 }
  0x36   :  { %146 = vadd.xlane.f32.xlu1 %v145_v33  ;;  %v125_v13 = vadd.f32 %v124_v57, %v46_v34  ;;  %v229_v14 = vmul.f32 %v52_v38, %v52_v38  ;;  %v307_v19 = vadd.f32 %v306_v5, %v227_v61  ;;  %v231_v31 = vmul.f32 %v54_v52, %v54_v52 }
  0x37   :  { %331 = vadd.xlane.f32.xlu2 %v330_v62  ;;  %v319_v15 = vadd.f32 %v318_v56, %v237_v0  ;;  %v221_v20 = vmul.f32 %v44_v21, %v44_v21  ;;  %v297_v22 = vadd.f32 %v219_v16, %v218_v45  ;;  %v230_v8 = vmul.f32 %v53_v48, %v53_v48 }
  0x38   :  { %v308_v25 = vadd.f32 %v307_v19, %v228_v37  ;;  %v111_v9 = vadd.f32 %v1498_v11, %v1496_v7  ;;  %v211_v4 = vmul.f32 %v1496_v7, %v1496_v7  ;;  %v222_v26 = vmul.f32 %v45_v50, %v45_v50 }
  0x39   :  { %v321_v18 = vadd.f32 %v320_v1, %v319_v15  ;;  %v298_v27 = vadd.f32 %v297_v22, %v220_v6  ;;  %v212_v38 = vmul.f32 %v1498_v11, %v1498_v11  ;;  %v127_v21 = vadd.f32 %v126_v55, %v125_v13 }
  0x3a   :  { %v309_v39 = vadd.f32 %v308_v25, %v229_v14  ;;  %v112_v35 = vadd.f32 %v111_v9, %v1500_v17  ;;  %v213_v40 = vmul.f32 %v1500_v17, %v1500_v17  ;;  %v311_v32 = vsel %vm116_vm0, %v231_v31, 0.0 }
  0x3b   :  { %137 = vadd.xlane.f32.xlu0 %v136_v12  ;;  %v223_v41 = vmul.f32 %v46_v34, %v46_v34  ;;  %v224_v42 = vmul.f32 %v47_v36, %v47_v36  ;;  %v299_v46 = vadd.f32 %v298_v27, %v221_v20  ;;  %v214_v49 = vmul.f32 %v1506_v23, %v1506_v23 }
  0x3c   :  { %v310_v44 = vadd.f32 %v309_v39, %v230_v8  ;;  %v113_v48 = vadd.f32 %v112_v35, %v1506_v23  ;;  %v288_v50 = vadd.f32 %v212_v38, %v211_v4  ;;  %v215_v52 = vmul.f32 %v38_v29, %v38_v29 }
  0x3d   :  { %v300_v51 = vadd.f32 %v299_v46, %v222_v26  ;;  %v117_v36 = vsel %vm116_vm0, %v40_v47, 0.0  ;;  %v217_v58 = vmul.f32 %v40_v47, %v40_v47  ;;  %v302_v43 = vsel %vm116_vm0, %v224_v42, 0.0 }
  0x3e   :  { %322 = vadd.xlane.f32.xlu1 %v321_v18  ;;  %v312_v28 = vadd.f32 %v311_v32, %v310_v44  ;;  %v114_v24 = vadd.f32 %v113_v48, %v38_v29  ;;  %v289_v53 = vadd.f32 %v288_v50, %v213_v40  ;;  %v216_v33 = vmul.f32 %v39_v30, %v39_v30 }
  0x3f   :  { %128 = vadd.xlane.f32.xlu2 %v127_v21  ;;  %v301_v54 = vadd.f32 %v300_v51, %v223_v41  ;;  %v293_v63 = vsel %vm116_vm0, %v217_v58, 0.0  ;;  %v1382_v16 = vmov 0  }
  0x40   :  { %v115_v59 = vadd.f32 %v114_v24, %v39_v30  ;;  %v290_v60 = vadd.f32 %v289_v53, %v214_v49  ;;  %1232 = vset.pattern.permute.xlu2 %v1382_v16  ;;  %1231 = vset.pattern.permute.xlu1 %v1382_v16 }
  0x41   :  { %v303_v62 = vadd.f32 %v302_v43, %v301_v54  ;;  %1233 = vset.pattern.permute.xlu0 %v1382_v16 }
  0x42   :  { %v118_v57 = vadd.f32 %v117_v36, %v115_v59  ;;  %v291_v61 = vadd.f32 %v290_v60, %v215_v52 }
  0x43   :  { %313 = vadd.xlane.f32.xlu0 %v312_v28 }
  0x44   :  { %v292_v34 = vadd.f32 %v291_v61, %v216_v33 }
  0x46   :  { %119 = vadd.xlane.f32.xlu1 %v118_v57  ;;  %v294_v0 = vadd.f32 %v293_v63, %v292_v34 }
  0x47   :  { %304 = vadd.xlane.f32.xlu2 %v303_v62 }
  0x4b   :  { %295 = vadd.xlane.f32.xlu0 %v294_v0 }
  0x86   :  { %v210_v3 = vpop.xlane.xlu0 %209 }
  0x87   :  { %v1528_v19 = vmul.f32 0.0012755102, %v210_v3 }
  0x89   :  { %v192_v55 = vpop.xlane.xlu1 %191  ;;  %v419_v4 = vmul.f32 %v1528_v19, %v1528_v19 }
  0x8a   :  { %v183_v1 = vpop.xlane.xlu2 %182  ;;  %v1522_v56 = vmul.f32 0.0012755102, %v192_v55 }
  0x8b   :  { %v1530_v20 = vmul.f32 0.0012755102, %v183_v1 }
  0x8c   :  { %v417_v14 = vmul.f32 %v1522_v56, %v1522_v56 }
  0x8d   :  { %v416_v27 = vmul.f32 %v1530_v20, %v1530_v20 }
  0x8e   :  { %v201_v37 = vpop.xlane.xlu0 %200 }
  0x8f   :  { %v1520_v5 = vmul.f32 0.0012755102, %v201_v37 }
  0x91   :  { %v174_v45 = vpop.xlane.xlu1 %173  ;;  %v418_v6 = vmul.f32 %v1520_v5, %v1520_v5 }
  0x92   :  { %v377_v12 = vpop.xlane.xlu2 %376  ;;  %v1536_v39 = vmul.f32 0.0012755102, %v174_v45 }
  0x93   :  { %v407_v13 = vmul.f32 0.0012755102, %v377_v12 }
  0x94   :  { %v415_v29 = vmul.f32 %v1536_v39, %v1536_v39 }
  0x95   :  { %v429_v15 = vsub.f32 %v407_v13, %v418_v6  ;;  %v451_v13 = vld [vmem:[%s2052_s1 + $0x48] sm:$0xff] }
  0x96   :  { %v368_v31 = vpop.xlane.xlu0 %367 }
  0x97   :  { %v406_v22 = vmul.f32 0.0012755102, %v368_v31  ;;  %v440_v8 = vmax.f32 %v429_v15, 0.0 }
  0x99   :  { %v428_v25 = vsub.f32 %v406_v22, %v417_v14  ;;  %v386_v9 = vpop.xlane.xlu1 %385  ;;  %v462_v18 = vadd.f32 0.001, %v440_v8 }
  0x9a   :  { %v408_v26 = vmul.f32 0.0012755102, %v386_v9  ;;  %v359_v21 = vpop.xlane.xlu2 %358 }
  0x9b   :  { %v439_v38 = vmax.f32 %v428_v25, 0.0  ;;  %1234 = vrsqrt.f32 %v462_v18  ;;  %v405_v35 = vmul.f32 0.0012755102, %v359_v21  ;;  %vm560_vm2 = vweird.f32 %v462_v18 }
  0x9c   :  { %v430_v40 = vsub.f32 %v408_v26, %v419_v4 }
  0x9d   :  { %v1538_v32 = vadd.f32 0.001, %v439_v38  ;;  %v427_v41 = vsub.f32 %v405_v35, %v416_v27 }
  0x9e   :  { %v441_v42 = vmax.f32 %v430_v40, 0.0  ;;  %v165_v46 = vpop.xlane.xlu0 %164 }
  0x9f   :  { %1236 = vrsqrt.f32 %v1538_v32  ;;  %v438_v44 = vmax.f32 %v427_v41, 0.0  ;;  %v1545_v49 = vmul.f32 0.0012755102, %v165_v46  ;;  %vm550_vm6 = vweird.f32 %v1538_v32 }
  0xa0   :  { %v1543_v47 = vadd.f32 0.001, %v441_v42 }
  0xa1   :  { %v350_v48 = vpop.xlane.xlu1 %349  ;;  %v1235_v50 = vpop.eup %1234  ;;  %v1547_v51 = vadd.f32 0.001, %v438_v44  ;;  %v414_v36 = vmul.f32 %v1545_v49, %v1545_v49 }
  0xa2   :  { %1238 = vrsqrt.f32 %v1543_v47  ;;  %v404_v30 = vmul.f32 0.0012755102, %v350_v48  ;;  %v555_v28 = vmul.f32 %v1235_v50, %v462_v18  ;;  %v156_v24 = vpop.xlane.xlu2 %155  ;;  %vm561_vm1 = vweird.f32 %v1235_v50 }
  0xa3   :  { %1240 = vrsqrt.f32 %v1547_v51  ;;  %v1562_v63 = vmul.f32 0.0012755102, %v156_v24  ;;  %vm562_vm3 = vmor %vm560_vm2, %vm561_vm1  ;;  %vm570_vm7 = vweird.f32 %v1543_v47  ;;  %vm540_vm11 = vweird.f32 %v1547_v51 }
  0xa4   :  { %v426_v52 = vsub.f32 %v404_v30, %v415_v29  ;;  %v556_v54 = vmul.f32 %v1235_v50, %v555_v28 }
  0xa5   :  { %v1551_v53 = vpop.eup %1236  ;;  %v413_v31 = vmul.f32 %v1562_v63, %v1562_v63 }
  0xa6   :  { %v545_v58 = vmul.f32 %v1551_v53, %v1538_v32  ;;  %v437_v43 = vmax.f32 %v426_v52, 0.0  ;;  %v341_v59 = vpop.xlane.xlu0 %340  ;;  %v557_v33 = vmul.f32 0.5, %v556_v54  ;;  %vm551_vm5 = vweird.f32 %v1551_v53 }
  0xa7   :  { %v403_v60 = vmul.f32 0.0012755102, %v341_v59  ;;  %vm1603_vm8 = vmor %vm550_vm6, %vm551_vm5 }
  0xa8   :  { %v1557_v57 = vpop.eup %1238  ;;  %v546_v61 = vmul.f32 %v1551_v53, %v545_v58  ;;  %v1560_v62 = vadd.f32 0.001, %v437_v43  ;;  %v558_v34 = vsub.f32 1.5, %v557_v33  ;;  %v450_v58 = vld [vmem:[%s2052_s1 + $0x40] sm:$0xff] }
  0xa9   :  { %v565_v0 = vmul.f32 %v1557_v57, %v1543_v47  ;;  %v425_v3 = vsub.f32 %v403_v60, %v414_v36  ;;  %v147_v55 = vpop.xlane.xlu1 %146  ;;  %v1566_v1 = vpop.eup %1240  ;;  %vm571_vm4 = vweird.f32 %v1557_v57  ;;  %v452_v47 = vld [vmem:[%s2052_s1 + $0x50] sm:$0xff] }
  0xaa   :  { %v547_v37 = vmul.f32 0.5, %v546_v61  ;;  %1242 = vrsqrt.f32 %v1560_v62  ;;  %v535_v45 = vmul.f32 %v1566_v1, %v1547_v51  ;;  %v332_v12 = vpop.xlane.xlu2 %331  ;;  %v559_v14 = vmul.f32 %v1235_v50, %v558_v34  ;;  %vm572_vm9 = vmor %vm570_vm7, %vm571_vm4  ;;  %v449_v51 = vld [vmem:[%s2052_s1 + $0x38] sm:$0xff] }
  0xab   :  { %v566_v16 = vmul.f32 %v1557_v57, %v565_v0  ;;  %v436_v6 = vmax.f32 %v425_v3, 0.0  ;;  %v402_v22 = vmul.f32 0.0012755102, %v332_v12  ;;  %v1577_v8 = vmul.f32 0.0012755102, %v147_v55 }
  0xac   :  { %v548_v15 = vsub.f32 1.5, %v547_v37  ;;  %v536_v25 = vmul.f32 %v1566_v1, %v535_v45  ;;  %v563_v18 = vsel %vm562_vm3, %v1235_v50, %v559_v14  ;;  %vm541_vm10 = vweird.f32 %v1566_v1 }
  0xad   :  { %v567_v9 = vmul.f32 0.5, %v566_v16  ;;  %v1581_v4 = vadd.f32 0.001, %v436_v6  ;;  %v424_v26 = vsub.f32 %v402_v22, %v413_v31  ;;  %v1583_v27 = vmul.f32 %v563_v18, %v451_v13  ;;  %vm1640_vm12 = vmor %vm540_vm11, %vm541_vm10 }
  0xae   :  { %v138_v38 = vpop.xlane.xlu0 %137  ;;  %v537_v21 = vmul.f32 0.5, %v536_v25  ;;  %v549_v40 = vmul.f32 %v1551_v53, %v548_v15  ;;  %v412_v46 = vmul.f32 %v1577_v8, %v1577_v8  ;;  %vm530_vm2 = vweird.f32 %v1560_v62 }
  0xaf   :  { %v568_v35 = vsub.f32 1.5, %v567_v9  ;;  %1244 = vrsqrt.f32 %v1581_v4  ;;  %v435_v42 = vmax.f32 %v424_v26, 0.0  ;;  %665 = vperm.xlu2 %1232, %v1583_v27   ;;  %v1598_v44 = vmul.f32 0.0012755102, %v138_v38 }
  0xb0   :  { %v1589_v41 = vpop.eup %1242  ;;  %v538_v24 = vsub.f32 1.5, %v537_v21  ;;  %v553_v43 = vsel %vm1603_vm8, %v1551_v53, %v549_v40  ;;  %vm520_vm14 = vweird.f32 %v1581_v4 }
  0xb1   :  { %v525_v29 = vmul.f32 %v1589_v41, %v1560_v62  ;;  %v323_v48 = vpop.xlane.xlu1 %322  ;;  %v569_v50 = vmul.f32 %v1557_v57, %v568_v35  ;;  %v1607_v30 = vadd.f32 0.001, %v435_v42  ;;  %v411_v60 = vmul.f32 %v1598_v44, %v1598_v44 }
  0xb2   :  { %v401_v28 = vmul.f32 0.0012755102, %v323_v48  ;;  %v129_v54 = vpop.xlane.xlu2 %128  ;;  %v1628_v0 = vmul.f32 %v553_v43, %v450_v58  ;;  %v539_v53 = vmul.f32 %v1566_v1, %v538_v24  ;;  %vm531_vm15 = vweird.f32 %v1589_v41 }
  0xb3   :  { %v526_v52 = vmul.f32 %v1589_v41, %v525_v29  ;;  %v573_v36 = vsel %vm572_vm9, %v1557_v57, %v569_v50  ;;  %1246 = vrsqrt.f32 %v1607_v30  ;;  %v1633_v16 = vmul.f32 0.0012755102, %v129_v54  ;;  %vm1676_vm5 = vmor %vm530_vm2, %vm531_vm15 }
  0xb4   :  { %v423_v59 = vsub.f32 %v401_v28, %v412_v46  ;;  %v1625_v61 = vmul.f32 %v573_v36, %v452_v47  ;;  %v543_v38 = vsel %vm1640_vm12, %v1566_v1, %v539_v53  ;;  %v447_v1 = vld [vmem:[%s2052_s1 + $0x28] sm:$0xff]  ;;  %vm510_vm4 = vweird.f32 %v1607_v30 }
  0xb5   :  { %v1245_v33 = vpop.eup %1244  ;;  %v527_v55 = vmul.f32 0.5, %v526_v52  ;;  %v410_v35 = vmul.f32 %v1633_v16, %v1633_v16  ;;  %v1660_v50 = vmul.f32 %v543_v38, %v449_v51 }
  0xb6   :  { %v515_v34 = vmul.f32 %v1245_v33, %v1581_v4  ;;  %v434_v57 = vmax.f32 %v423_v59, 0.0  ;;  %v314_v3 = vpop.xlane.xlu0 %313  ;;  %670 = vperm.xlu1 %1231, %v1625_v61   ;;  %vm521_vm13 = vweird.f32 %v1245_v33 }
  0xb7   :  { %v400_v37 = vmul.f32 0.0012755102, %v314_v3  ;;  %660 = vperm.xlu2 %1232, %v1628_v0   ;;  %v528_v25 = vsub.f32 1.5, %v527_v55  ;;  %vm522_vm1 = vmor %vm520_vm14, %vm521_vm13 }
  0xb8   :  { %v516_v45 = vmul.f32 %v1245_v33, %v515_v34  ;;  %v1635_v6 = vadd.f32 0.001, %v434_v57 }
  0xb9   :  { %v422_v12 = vsub.f32 %v400_v37, %v411_v60  ;;  %v120_v13 = vpop.xlane.xlu1 %119  ;;  %v1247_v14 = vpop.eup %1246  ;;  %v529_v24 = vmul.f32 %v1589_v41, %v528_v25 }
  0xba   :  { %v517_v15 = vmul.f32 0.5, %v516_v45  ;;  %1248 = vrsqrt.f32 %v1635_v6  ;;  %v1644_v22 = vmul.f32 0.0012755102, %v120_v13  ;;  %v505_v9 = vmul.f32 %v1247_v14, %v1607_v30  ;;  %v305_v26 = vpop.xlane.xlu2 %304  ;;  %v448_v30 = vld [vmem:[%s2052_s1 + $0x30] sm:$0xff] }
  0xbb   :  { %v433_v18 = vmax.f32 %v422_v12, 0.0  ;;  %v399_v40 = vmul.f32 0.0012755102, %v305_v26  ;;  %vm511_vm3 = vweird.f32 %v1247_v14  ;;  %v533_v37 = vsel %vm1676_vm5, %v1589_v41, %v529_v24 }
  0xbc   :  { %v518_v21 = vsub.f32 1.5, %v517_v15  ;;  %v506_v42 = vmul.f32 %v1247_v14, %v505_v9  ;;  %v409_v29 = vmul.f32 %v1644_v22, %v1644_v22  ;;  %vm500_vm6 = vweird.f32 %v1635_v6  ;;  %vm512_vm7 = vmor %vm510_vm4, %vm511_vm3 }
  0xbd   :  { %v1656_v46 = vadd.f32 0.001, %v433_v18  ;;  %v421_v48 = vsub.f32 %v399_v40, %v410_v35  ;;  %v580_v25 = vmul.f32 %v533_v37, %v448_v30  ;;  %vm962_vm4 = vcmask 719872  }
  0xbe   :  { %v296_v32 = vpop.xlane.xlu0 %295  ;;  %v519_v28 = vmul.f32 %v1245_v33, %v518_v21  ;;  %v507_v47 = vmul.f32 0.5, %v506_v42 }
  0xbf   :  { %1250 = vrsqrt.f32 %v1656_v46  ;;  %v398_v4 = vmul.f32 0.0012755102, %v296_v32  ;;  %v432_v54 = vmax.f32 %v421_v48, 0.0  ;;  %655 = vperm.xlu2 %1232, %v1660_v50   ;;  %vm490_vm11 = vweird.f32 %v1656_v46 }
  0xc0   :  { %v1249_v52 = vpop.eup %1248  ;;  %v523_v36 = vsel %vm522_vm1, %v1245_v33, %v519_v28  ;;  %v508_v58 = vsub.f32 1.5, %v507_v47  ;;  %v446_v33 = vld [vmem:[%s2052_s1 + $0x20] sm:$0xff]  ;;  %v602_v24 = vmul.f32 %v580_v25, %v1536_v39  ;;  %v595_v39 = vld [vmem:[%s2053_s2 + $0x50] sm:$0xff] }
  0xc1   :  { %v495_v43 = vmul.f32 %v1249_v52, %v1635_v6  ;;  %v420_v59 = vsub.f32 %v398_v4, %v409_v29  ;;  %v1671_v60 = vmul.f32 %v523_v36, %v447_v1  ;;  %v454_v34 = vadd.f32 0.001, %v432_v54  ;;  %v444_v6 = vld [vmem:[%s2052_s1 + $0x10] sm:$0xff] }
  0xc2   :  { %v509_v55 = vmul.f32 %v1247_v14, %v508_v58  ;;  %vm501_vm8 = vweird.f32 %v1249_v52  ;;  %v591_v36 = vld [vmem:[%s2053_s2 + $0x30] sm:$0xff] }
  0xc3   :  { %v496_v62 = vmul.f32 %v1249_v52, %v495_v43  ;;  %v431_v3 = vmax.f32 %v420_v59, 0.0  ;;  %645 = vperm.xlu0 %1233, %v1671_v60   ;;  %1252 = vrsqrt.f32 %v454_v34  ;;  %vm502_vm9 = vmor %vm500_vm6, %vm501_vm8  ;;  %vm480_vm14 = vweird.f32 %v454_v34 }
  0xc4   :  { %v513_v13 = vsel %vm512_vm7, %v1247_v14, %v509_v55  ;;  %v445_v14 = vld [vmem:[%s2052_s1 + $0x18] sm:$0xff]  ;;  %v606_v43 = vmul.f32 %v1625_v61, %v1528_v19  ;;  %v613_v57 = vsub.f32 %v591_v36, %v602_v24  ;;  %v594_v19 = vld [vmem:[%s2053_s2 + $0x48] sm:$0xff]  ;;  %v601_v30 = vmul.f32 %v1671_v60, %v1545_v49  ;;  %v593_v49 = vld [vmem:[%s2053_s2 + $0x40] sm:$0xff] }
  0xc5   :  { %v1251_v53 = vpop.eup %1250  ;;  %v497_v45 = vmul.f32 0.5, %v496_v62  ;;  %v1692_v12 = vadd.f32 0.001, %v431_v3  ;;  %v1695_v31 = vmul.f32 %v513_v13, %v446_v33  ;;  %v605_v3 = vmul.f32 %v1583_v27, %v1520_v5  ;;  %v588_v61 = vld [vmem:[%s2053_s2 + $0x18] sm:$0xff]  ;;  %v442_v60 = vld [vmem:[%s2052_s1] sm:$0xff] }
  0xc6   :  { %v485_v15 = vmul.f32 %v1251_v53, %v1656_v46  ;;  %vm491_vm10 = vweird.f32 %v1251_v53  ;;  %v443_v46 = vld [vmem:[%s2052_s1 + $0x8] sm:$0xff]  ;;  %v617_v62 = vsub.f32 %v595_v39, %v606_v43 }
  0xc7   :  { %v498_v9 = vsub.f32 1.5, %v497_v45  ;;  %1254 = vrsqrt.f32 %v1692_v12  ;;  %640 = vperm.xlu1 %1231, %v1695_v31   ;;  %650 = vperm.xlu2 %1232, %v580_v25   ;;  %vm492_vm12 = vmor %vm490_vm11, %vm491_vm10  ;;  %vm470_vm1 = vweird.f32 %v1692_v12  ;;  %v616_v37 = vsub.f32 %v594_v19, %v605_v3  ;;  %v1261_v19 = vld [vmem:[#allocation2 + $0x200] sm:$0xff] }
  0xc8   :  { %v486_v41 = vmul.f32 %v1251_v53, %v485_v15  ;;  %v604_v45 = vmul.f32 %v1628_v0, %v1522_v56  ;;  %v603_v0 = vmul.f32 %v1660_v50, %v1530_v20  ;;  %v589_v20 = vld [vmem:[%s2053_s2 + $0x20] sm:$0xff] }
  0xc9   :  { %v499_v18 = vmul.f32 %v1249_v52, %v498_v9  ;;  %v1253_v26 = vpop.eup %1252  ;;  %v587_v9 = vld [vmem:[%s2053_s2 + $0x10] sm:$0xff] }
  0xca   :  { %v487_v51 = vmul.f32 0.5, %v486_v41  ;;  %v475_v38 = vmul.f32 %v1253_v26, %v454_v34  ;;  %vm481_vm13 = vweird.f32 %v1253_v26  ;;  %v615_v15 = vsub.f32 %v593_v49, %v604_v45  ;;  %v592_v41 = vld [vmem:[%s2053_s2 + $0x38] sm:$0xff] }
  0xcb   :  { %v503_v21 = vsel %vm502_vm9, %v1249_v52, %v499_v18  ;;  %vm482_vm15 = vmor %vm480_vm14, %vm481_vm13  ;;  %v585_v18 = vld [vmem:[%s2053_s2] sm:$0xff] }
  0xcc   :  { %v488_v35 = vsub.f32 1.5, %v487_v51  ;;  %v577_v40 = vmul.f32 %v503_v21, %v445_v14  ;;  %v476_v29 = vmul.f32 %v1253_v26, %v475_v38  ;;  %v600_v51 = vmul.f32 %v1695_v31, %v1562_v63 }
  0xcd   :  { %v1255_v42 = vpop.eup %1254 }
  0xce   :  { %v489_v48 = vmul.f32 %v1251_v53, %v488_v35  ;;  %v477_v32 = vmul.f32 0.5, %v476_v29  ;;  %v465_v1 = vmul.f32 %v1255_v42, %v1692_v12  ;;  %v599_v33 = vmul.f32 %v577_v40, %v1577_v8  ;;  %v590_v8 = vld [vmem:[%s2053_s2 + $0x28] sm:$0xff] }
  0xcf   :  { %635 = vperm.xlu2 %1232, %v577_v40   ;;  %vm471_vm2 = vweird.f32 %v1255_v42  ;;  %v611_v50 = vsub.f32 %v589_v20, %v600_v51 }
  0xd0   :  { %v493_v28 = vsel %vm492_vm12, %v1251_v53, %v489_v48  ;;  %v478_v47 = vsub.f32 1.5, %v477_v32  ;;  %v466_v52 = vmul.f32 %v1255_v42, %v465_v1  ;;  %v610_v5 = vsub.f32 %v588_v61, %v599_v33  ;;  %vm472_vm3 = vmor %vm470_vm1, %vm471_vm2  ;;  %v1256_v32 = vld [vmem:[#allocation2 + $0x230] sm:$0xff]  ;;  %v1260_v33 = vld [vmem:[#allocation2 + $0x1f8] sm:$0xff] }
  0xd1   :  { %v576_v4 = vmul.f32 %v493_v28, %v444_v6  ;;  %v612_v53 = vsub.f32 %v590_v8, %v601_v30  ;;  %v1257_v28 = vld [vmem:[#allocation2 + $0x238] sm:$0xff]  ;;  %v1262_v30 = vld [vmem:[#allocation2 + $0x208] sm:$0xff]  ;;  %v1263_v8 = vld [vmem:[#allocation2 + $0x210] sm:$0xff] }
  0xd2   :  { %v479_v54 = vmul.f32 %v1253_v26, %v478_v47  ;;  %v467_v34 = vmul.f32 0.5, %v466_v52  ;;  %v1259_v52 = vld [vmem:[#allocation2 + $0x248] sm:$0xff] }
  0xd3   :  { %630 = vperm.xlu0 %1233, %v576_v4   ;;  %v598_v13 = vmul.f32 %v576_v4, %v1598_v44  ;;  %v614_v44 = vsub.f32 %v592_v41, %v603_v0  ;;  %v1258_v4 = vld [vmem:[#allocation2 + $0x240] sm:$0xff]  ;;  %v1265_v41 = vld [vmem:[#allocation2 + $0x1c8] sm:$0xff] }
  0xd4   :  { %v483_v58 = vsel %vm482_vm15, %v1253_v26, %v479_v54  ;;  %v468_v55 = vsub.f32 1.5, %v467_v34 }
  0xd5   :  { %v575_v59 = vmul.f32 %v483_v58, %v443_v46  ;;  %v609_v56 = vsub.f32 %v587_v9, %v598_v13 }
  0xd6   :  { %v469_v27 = vmul.f32 %v1255_v42, %v468_v55 }
  0xd7   :  { %625 = vperm.xlu1 %1231, %v575_v59   ;;  %782 = vperm.xlu2 %1232, %v613_v57   ;;  %v597_v38 = vmul.f32 %v575_v59, %v1633_v16 }
  0xd8   :  { %v473_v12 = vsel %vm472_vm3, %v1255_v42, %v469_v27 }
  0xd9   :  { %v574_v25 = vmul.f32 %v473_v12, %v442_v60 }
  0xdb   :  { %802 = vperm.xlu0 %1233, %v617_v62   ;;  %v596_v14 = vmul.f32 %v574_v25, %v1644_v22  ;;  %v586_v22 = vld [vmem:[%s2053_s2 + $0x8] sm:$0xff] }
  0xdc   :  { %v608_v21 = vsub.f32 %v586_v22, %v597_v38  ;;  %v1269_v22 = vld [vmem:[#allocation2 + $0x220] sm:$0xff] }
  0xdd   :  { %v607_v26 = vsub.f32 %v585_v18, %v596_v14 }
  0xdf   :  { %797 = vperm.xlu1 %1231, %v616_v37   ;;  %767 = vperm.xlu2 %1232, %v610_v5  }
  0xe3   :  { %777 = vperm.xlu0 %1233, %v612_v53  }
  0xe7   :  { %792 = vperm.xlu1 %1231, %v615_v15   ;;  %620 = vperm.xlu2 %1232, %v574_v25  }
  0xeb   :  { %762 = vperm.xlu0 %1233, %v609_v56   ;;  %v1264_v56 = vld [vmem:[#allocation2 + $0x1c0] sm:$0xff] }
  0xef   :  { %787 = vperm.xlu1 %1231, %v614_v44   ;;  %v1266_v44 = vld [vmem:[#allocation2 + $0x1d0] sm:$0xff] }
  0xf3   :  { %752 = vperm.xlu0 %1233, %v607_v26   ;;  %v1267_v26 = vld [vmem:[#allocation2 + $0x1d8] sm:$0xff] }
  0xf7   :  { %772 = vperm.xlu1 %1231, %v611_v50   ;;  %v1268_v50 = vld [vmem:[#allocation2 + $0x218] sm:$0xff] }
  0xff   :  { %757 = vperm.xlu1 %1231, %v608_v21  }
 0x109   :  { %v1766_v35 = vpop.permute.xlu2 %665 }
 0x10a   :  { %v736_v55 = vmul.f32 %v1260_v33, %v1766_v35  ;;  %v737_v61 = vmul.f32 %v1261_v19, %v1766_v35  ;;  %v738_v37 = vmul.f32 %v1262_v30, %v1766_v35  ;;  %v739_v27 = vmul.f32 %v1263_v8, %v1766_v35  ;;  %v1276_v30 = vld [vmem:[#allocation2 + $0x1a0] sm:$0xff] }
 0x10b   :  { %v1815_v38 = vmul.f32 %v1268_v50, %v1766_v35  ;;  %v1818_v21 = vmul.f32 %v1269_v22, %v1766_v35  ;;  %v1284_v22 = vld [vmem:[#allocation2 + $0x260] sm:$0xff] }
 0x111   :  { %v1768_v40 = vpop.permute.xlu2 %660 }
 0x112   :  { %v729_v0 = vmul.f32 %v1264_v56, %v1768_v40  ;;  %v730_v14 = vmul.f32 %v1265_v41, %v1768_v40  ;;  %v731_v18 = vmul.f32 %v1266_v44, %v1768_v40  ;;  %v732_v51 = vmul.f32 %v1267_v26, %v1768_v40 }
 0x119   :  { %v1770_v63 = vpop.permute.xlu2 %655 }
 0x121   :  { %v1778_v6 = vpop.permute.xlu2 %650 }
 0x128   :  { %v1772_v31 = vpop.permute.xlu1 %670 }
 0x129   :  { %v743_v1 = vmul.f32 %v1256_v32, %v1772_v31  ;;  %v744_v47 = vmul.f32 %v1257_v28, %v1772_v31  ;;  %v745_v24 = vmul.f32 %v1258_v4, %v1772_v31  ;;  %v746_v46 = vmul.f32 %v1259_v52, %v1772_v31  ;;  %v1790_v36 = vpop.permute.xlu2 %635  ;;  %v1270_v32 = vld [vmem:[#allocation2 + $0x228] sm:$0xff]  ;;  %v1271_v28 = vld [vmem:[#allocation2 + $0x1e0] sm:$0xff] }
 0x12a   :  { %v697_v41 = vmul.f32 %v1790_v36, %v1477_v10 }
 0x131   :  { %v1806_v9 = vpop.permute.xlu2 %782 }
 0x135   :  { %v1774_v42 = vpop.permute.xlu0 %645 }
 0x139   :  { %v1776_v29 = vpop.permute.xlu1 %640 }
 0x145   :  { %v1780_v16 = vpop.permute.xlu0 %630 }
 0x149   :  { %v1782_v48 = vpop.permute.xlu1 %625 }
 0x14d   :  { %v1788_v54 = vpop.permute.xlu0 %802 }
 0x14e   :  { %v875_v58 = vadd.f32 %v1788_v54, %v743_v1  ;;  %v876_v43 = vadd.f32 %v1788_v54, %v744_v47  ;;  %v877_v59 = vadd.f32 %v1788_v54, %v745_v24  ;;  %v878_v57 = vadd.f32 %v1788_v54, %v746_v46 }
 0x14f   :  { %v1821_v1 = vmul.f32 %v1270_v32, %v1766_v35  ;;  %v1824_v47 = vmul.f32 %v1271_v28, %v1768_v40  ;;  %v1858_v32 = vmul.f32 %v1284_v22, %v1772_v31  ;;  %v1292_v22 = vld [vmem:[#allocation2 + $0xf8] sm:$0xff] }
 0x150   :  { %v952_v39 = vmax.f32 %v875_v58, 0.0  ;;  %v953_v34 = vmax.f32 %v876_v43, 0.0  ;;  %v954_v62 = vmax.f32 %v877_v59, 0.0  ;;  %v955_v3 = vmax.f32 %v878_v57, 0.0  ;;  %v1272_v43 = vld [vmem:[#allocation2 + $0x188] sm:$0xff]  ;;  %v1273_v57 = vld [vmem:[#allocation2 + $0x190] sm:$0xff] }
 0x151   :  { %v1799_v5 = vpop.permute.xlu1 %797  ;;  %v722_v59 = vmul.f32 %v1272_v43, %v1770_v63  ;;  %v723_v35 = vmul.f32 %v1273_v57, %v1770_v63 }
 0x152   :  { %977 = vmatpush.msra.mxu0 %v952_v39  ;;  %1003 = vmatpush.msra.mxu1 %v953_v34  ;;  %v868_v53 = vadd.f32 %v1799_v5, %v736_v55  ;;  %v869_v45 = vadd.f32 %v1799_v5, %v737_v61  ;;  %v870_v49 = vadd.f32 %v1799_v5, %v738_v37  ;;  %v1274_v39 = vld [vmem:[#allocation2 + $0x198] sm:$0xff] }
 0x153   :  { %1029 = vmatpush.msra.mxu2 %v954_v62  ;;  %1055 = vmatpush.msra.mxu3 %v955_v3  ;;  %v871_v60 = vadd.f32 %v1799_v5, %v739_v27  ;;  %v724_v34 = vmul.f32 %v1274_v39, %v1770_v63  ;;  %v1275_v62 = vld [vmem:[#allocation2 + $0x150] sm:$0xff]  ;;  %v725_v37 = vmul.f32 %v1276_v30, %v1770_v63  ;;  %v1277_v27 = vld [vmem:[#allocation2 + $0x158] sm:$0xff] }
 0x154   :  { %v945_v12 = vmax.f32 %v868_v53, 0.0  ;;  %v946_v13 = vmax.f32 %v869_v45, 0.0  ;;  %v947_v15 = vmax.f32 %v870_v49, 0.0  ;;  %v715_v3 = vmul.f32 %v1275_v62, %v1778_v6  ;;  %v1278_v45 = vld [vmem:[#allocation2 + $0x160] sm:$0xff] }
 0x155   :  { %v948_v25 = vmax.f32 %v871_v60, 0.0  ;;  %v1826_v4 = vpop.permute.xlu0 %777  ;;  %v716_v53 = vmul.f32 %v1277_v27, %v1778_v6  ;;  %v717_v49 = vmul.f32 %v1278_v45, %v1778_v6  ;;  %v1279_v60 = vld [vmem:[#allocation2 + $0x168] sm:$0xff] }
 0x156   :  { %978 = vmatpush.msra.mxu0 %v945_v12  ;;  %1004 = vmatpush.msra.mxu1 %v946_v13  ;;  %v1838_v8 = vadd.f32 %v1806_v9, %v715_v3  ;;  %v718_v12 = vmul.f32 %v1279_v60, %v1778_v6  ;;  %v1280_v13 = vld [vmem:[#allocation2 + $0xa8] sm:$0xff] }
 0x157   :  { %1030 = vmatpush.msra.mxu2 %v947_v15  ;;  %1056 = vmatpush.msra.mxu3 %v948_v25  ;;  %v694_v15 = vmul.f32 %v1280_v13, %v1790_v36  ;;  %v1281_v25 = vld [vmem:[#allocation2 + $0xb0] sm:$0xff]  ;;  %v849_v26 = vadd.f32 %v1806_v9, %v717_v49  ;;  %v1289_v49 = vld [vmem:[#allocation2 + $0xe0] sm:$0xff]  ;;  %v1290_v13 = vld [vmem:[#allocation2 + $0xe8] sm:$0xff] }
 0x158   :  { %v695_v56 = vmul.f32 %v1281_v25, %v1790_v36  ;;  %v924_v10 = vmax.f32 %v1838_v8, 0.0  ;;  %v701_v60 = vmul.f32 %v1289_v49, %v1776_v29  ;;  %v702_v25 = vmul.f32 %v1290_v13, %v1776_v29 }
 0x159   :  { %v1812_v20 = vpop.permute.xlu1 %792 }
 0x15a   :  { %v861_v24 = vadd.f32 %v1812_v20, %v729_v0  ;;  %v862_v52 = vadd.f32 %v1812_v20, %v730_v14  ;;  %v863_v46 = vadd.f32 %v1812_v20, %v731_v18  ;;  %v864_v58 = vadd.f32 %v1812_v20, %v732_v51  ;;  %v1282_v14 = vld [vmem:[#allocation2 + $0x250] sm:$0xff]  ;;  %v1283_v51 = vld [vmem:[#allocation2 + $0x258] sm:$0xff] }
 0x15b   :  { %v696_v0 = vmul.f32 %v1790_v36, %v1471_v2  ;;  %v1850_v44 = vmul.f32 %v1282_v14, %v1772_v31  ;;  %v848_v18 = vadd.f32 %v1806_v9, %v716_v53  ;;  %v1855_v50 = vmul.f32 %v1283_v51, %v1772_v31  ;;  %v1860_v2 = vpop.permute.xlu2 %767  ;;  %v1291_v14 = vld [vmem:[#allocation2 + $0xf0] sm:$0xff] }
 0x15c   :  { %v938_v33 = vmax.f32 %v861_v24, 0.0  ;;  %v939_v55 = vmax.f32 %v862_v52, 0.0  ;;  %v940_v19 = vmax.f32 %v863_v46, 0.0  ;;  %v941_v61 = vmax.f32 %v864_v58, 0.0  ;;  %v1285_v52 = vld [vmem:[#allocation2 + $0x118] sm:$0xff]  ;;  %v1286_v58 = vld [vmem:[#allocation2 + $0x120] sm:$0xff] }
 0x15d   :  { %v850_v24 = vadd.f32 %v1806_v9, %v718_v12  ;;  %v708_v46 = vmul.f32 %v1285_v52, %v1774_v42  ;;  %v709_v43 = vmul.f32 %v1286_v58, %v1774_v42  ;;  %v1876_v8 = vpop.permute.xlu0 %762  ;;  %v925_v45 = vmax.f32 %v848_v18, 0.0 }
 0x15e   :  { %979 = vmatpush.msra.mxu0 %v938_v33  ;;  %1005 = vmatpush.msra.mxu1 %v939_v55  ;;  %v1287_v55 = vld [vmem:[#allocation2 + $0x128] sm:$0xff]  ;;  %v926_v12 = vmax.f32 %v849_v26, 0.0  ;;  %v703_v51 = vmul.f32 %v1291_v14, %v1776_v29  ;;  %v704_v52 = vmul.f32 %v1292_v22, %v1776_v29  ;;  %v827_v58 = vadd.f32 %v1860_v2, %v695_v56 }
 0x15f   :  { %1031 = vmatpush.msra.mxu2 %v940_v19  ;;  %1057 = vmatpush.msra.mxu3 %v941_v61  ;;  %v840_v3 = vadd.f32 %v1826_v4, %v708_v46  ;;  %v841_v33 = vadd.f32 %v1826_v4, %v709_v43  ;;  %v710_v19 = vmul.f32 %v1287_v55, %v1774_v42  ;;  %v1288_v61 = vld [vmem:[#allocation2 + $0x130] sm:$0xff]  ;;  %v927_v18 = vmax.f32 %v850_v24, 0.0 }
 0x160   :  { %v711_v30 = vmul.f32 %v1288_v61, %v1774_v42  ;;  %v826_v46 = vadd.f32 %v1860_v2, %v694_v15  ;;  %v828_v43 = vadd.f32 %v1860_v2, %v696_v0  ;;  %v1294_v15 = vld [vmem:[#allocation2 + $0x78] sm:$0xff]  ;;  %v1295_v61 = vld [vmem:[#allocation2 + $0x80] sm:$0xff] }
 0x161   :  { %v1862_v28 = vpop.permute.xlu1 %787  ;;  %v917_v26 = vmax.f32 %v840_v3, 0.0  ;;  %v688_v56 = vmul.f32 %v1294_v15, %v1780_v16  ;;  %v689_v0 = vmul.f32 %v1295_v61, %v1780_v16 }
 0x162   :  { %v854_v57 = vadd.f32 %v1862_v28, %v722_v59  ;;  %v855_v39 = vadd.f32 %v1862_v28, %v723_v35  ;;  %v856_v31 = vadd.f32 %v1862_v28, %v724_v34  ;;  %v857_v62 = vadd.f32 %v1862_v28, %v725_v37 }
 0x163   :  { %v842_v34 = vadd.f32 %v1826_v4, %v710_v19  ;;  %v843_v37 = vadd.f32 %v1826_v4, %v711_v30  ;;  %v820_v49 = vadd.f32 %v1876_v8, %v688_v56  ;;  %v821_v13 = vadd.f32 %v1876_v8, %v689_v0 }
 0x164   :  { %v931_v27 = vmax.f32 %v854_v57, 0.0  ;;  %v932_v59 = vmax.f32 %v855_v39, 0.0  ;;  %v933_v53 = vmax.f32 %v856_v31, 0.0  ;;  %v934_v35 = vmax.f32 %v857_v62, 0.0  ;;  %v1293_v31 = vld [vmem:[#allocation2 + $0x70] sm:$0xff] }
 0x165   :  { %v918_v57 = vmax.f32 %v841_v33, 0.0  ;;  %v829_v39 = vadd.f32 %v1860_v2, %v697_v41  ;;  %v687_v62 = vmul.f32 %v1293_v31, %v1780_v16  ;;  %v919_v24 = vmax.f32 %v842_v34, 0.0  ;;  %v1896_v33 = vpop.permute.xlu2 %620  ;;  %v1904_v14 = vpop.permute.xlu0 %752 }
 0x166   :  { %980 = vmatpush.msra.mxu0 %v931_v27  ;;  %1006 = vmatpush.msra.mxu1 %v932_v59  ;;  %v920_v19 = vmax.f32 %v843_v37, 0.0  ;;  %v903_v27 = vmax.f32 %v826_v46, 0.0  ;;  %v673_v22 = vmul.f32 %v1896_v33, %v1496_v7  ;;  %v898_v15 = vmax.f32 %v821_v13, 0.0 }
 0x167   :  { %1032 = vmatpush.msra.mxu2 %v933_v53  ;;  %1058 = vmatpush.msra.mxu3 %v934_v35  ;;  %v819_v59 = vadd.f32 %v1876_v8, %v687_v62  ;;  %v1296_v53 = vld [vmem:[#allocation2 + $0x88] sm:$0xff]  ;;  %v906_v46 = vmax.f32 %v829_v39, 0.0  ;;  %v897_v62 = vmax.f32 %v820_v49, 0.0 }
 0x168   :  { %981 = vmatpush.msra.mxu0 %v924_v10  ;;  %1007 = vmatpush.msra.mxu1 %v925_v45  ;;  %v690_v35 = vmul.f32 %v1296_v53, %v1780_v16  ;;  %v805_v61 = vadd.f32 %v1904_v14, %v673_v22  ;;  %v1301_v49 = vld [vmem:[#allocation2 + $0x1e8] sm:$0xff]  ;;  %v881_v22 = vadd.f32 %v1788_v54, %v1858_v32 }
 0x169   :  { %1033 = vmatpush.msra.mxu2 %v926_v12  ;;  %1059 = vmatpush.msra.mxu3 %v927_v18  ;;  %v1889_v55 = vpop.permute.xlu1 %772  ;;  %v904_v12 = vmax.f32 %v827_v58, 0.0  ;;  %v675_v18 = vmul.f32 %v1896_v33, %v1500_v17  ;;  %v1297_v58 = vld [vmem:[#allocation2 + $0x38] sm:$0xff]  ;;  %v896_v7 = vmax.f32 %v819_v59, 0.0  ;;  %v1300_v17 = vld [vmem:[#allocation2 + $0x50] sm:$0xff]  ;;  %v1303_v32 = vld [vmem:[#allocation2 + $0x1a8] sm:$0xff] }
 0x16a   :  { %982 = vmatpush.msra.mxu0 %v917_v26  ;;  %1008 = vmatpush.msra.mxu1 %v918_v57  ;;  %v833_v10 = vadd.f32 %v1889_v55, %v701_v60  ;;  %v834_v41 = vadd.f32 %v1889_v55, %v702_v25  ;;  %v835_v3 = vadd.f32 %v1889_v55, %v703_v51  ;;  %v905_v51 = vmax.f32 %v828_v43, 0.0  ;;  %v1298_v57 = vld [vmem:[#allocation2 + $0x40] sm:$0xff] }
 0x16b   :  { %1034 = vmatpush.msra.mxu2 %v919_v24  ;;  %1060 = vmatpush.msra.mxu3 %v920_v19  ;;  %v836_v30 = vadd.f32 %v1889_v55, %v704_v52  ;;  %v822_v25 = vadd.f32 %v1876_v8, %v690_v35  ;;  %v674_v52 = vmul.f32 %v1896_v33, %v1498_v11  ;;  %v1299_v11 = vld [vmem:[#allocation2 + $0x48] sm:$0xff] }
 0x16c   :  { %v910_v45 = vmax.f32 %v833_v10, 0.0  ;;  %v911_v34 = vmax.f32 %v834_v41, 0.0  ;;  %v912_v37 = vmax.f32 %v835_v3, 0.0  ;;  %v680_v26 = vmul.f32 %v1297_v58, %v1782_v48 }
 0x16d   :  { %v913_v60 = vmax.f32 %v836_v30, 0.0  ;;  %v681_v31 = vmul.f32 %v1298_v57, %v1782_v48  ;;  %v676_v43 = vmul.f32 %v1896_v33, %v1506_v23  ;;  %v682_v24 = vmul.f32 %v1299_v11, %v1782_v48 }
 0x16e   :  { %983 = vmatpush.msra.mxu0 %v910_v45  ;;  %1009 = vmatpush.msra.mxu1 %v911_v34  ;;  %v683_v19 = vmul.f32 %v1300_v17, %v1782_v48  ;;  %v899_v56 = vmax.f32 %v822_v25, 0.0  ;;  %v806_v23 = vadd.f32 %v1904_v14, %v674_v52  ;;  %v807_v30 = vadd.f32 %v1904_v14, %v675_v18  ;;  %v1941_v18 = vld [vmem:[%s2054_s3] sm:$0xff] }
 0x16f   :  { %1035 = vmatpush.msra.mxu2 %v912_v37  ;;  %1061 = vmatpush.msra.mxu3 %v913_v60  ;;  %v879_v45 = vadd.f32 %v1788_v54, %v1850_v44  ;;  %v880_v37 = vadd.f32 %v1788_v54, %v1855_v50  ;;  %v734_v60 = vmul.f32 %v1301_v49, %v1768_v40  ;;  %v882_v25 = vmax.f32 %v805_v61, 0.0 }
 0x170   :  { %984 = vmatpush.msra.mxu0 %v903_v27  ;;  %1010 = vmatpush.msra.mxu1 %v904_v12  ;;  %v808_v27 = vadd.f32 %v1904_v14, %v676_v43  ;;  %v1302_v12 = vld [vmem:[#allocation2 + $0x1f0] sm:$0xff]  ;;  %v872_v44 = vadd.f32 %v1799_v5, %v1815_v38  ;;  %v884_v52 = vmax.f32 %v807_v30, 0.0  ;;  %v874_v54 = vadd.f32 %v1799_v5, %v1821_v1  ;;  %v1305_v43 = vld [vmem:[#allocation2 + $0x1b8] sm:$0xff] }
 0x171   :  { %1036 = vmatpush.msra.mxu2 %v905_v51  ;;  %1062 = vmatpush.msra.mxu3 %v906_v46  ;;  %v1918_v39 = vpop.permute.xlu1 %757  ;;  %v735_v13 = vmul.f32 %v1302_v12, %v1768_v40  ;;  %v883_v51 = vmax.f32 %v806_v23, 0.0  ;;  %v873_v40 = vadd.f32 %v1799_v5, %v1818_v21  ;;  %v956_v46 = vmax.f32 %v879_v45, 0.0  ;;  %v1311_v45 = vld [vmem:[#allocation2 + $0x138] sm:$0xff] }
 0x172   :  { %985 = vmatpush.msra.mxu0 %v896_v7  ;;  %1011 = vmatpush.msra.mxu1 %v897_v62  ;;  %v812_v0 = vadd.f32 %v1918_v39, %v680_v26  ;;  %v813_v10 = vadd.f32 %v1918_v39, %v681_v31  ;;  %v814_v41 = vadd.f32 %v1918_v39, %v682_v24  ;;  %v885_v50 = vmax.f32 %v808_v27, 0.0  ;;  %v1304_v31 = vld [vmem:[#allocation2 + $0x1b0] sm:$0xff] }
 0x173   :  { %1037 = vmatpush.msra.mxu2 %v898_v15  ;;  %1063 = vmatpush.msra.mxu3 %v899_v56  ;;  %v815_v3 = vadd.f32 %v1918_v39, %v683_v19  ;;  %v865_v38 = vadd.f32 %v1812_v20, %v1824_v47  ;;  %v726_v58 = vmul.f32 %v1303_v32, %v1770_v63  ;;  %v957_v26 = vmax.f32 %v880_v37, 0.0  ;;  %v1306_v62 = vld [vmem:[#allocation2 + $0x170] sm:$0xff]  ;;  %v1307_v19 = vld [vmem:[#allocation2 + $0x178] sm:$0xff]  ;;  %v1312_v37 = vld [vmem:[#allocation2 + $0x140] sm:$0xff] }
 0x174   :  { %v889_v59 = vmax.f32 %v812_v0, 0.0  ;;  %v890_v53 = vmax.f32 %v813_v10, 0.0  ;;  %v891_v35 = vmax.f32 %v814_v41, 0.0  ;;  %v866_v57 = vadd.f32 %v1812_v20, %v734_v60  ;;  %v1310_v27 = vld [vmem:[#allocation2 + $0xd0] sm:$0xff]  ;;  %v1313_v60 = vld [vmem:[#allocation2 + $0x148] sm:$0xff] }
 0x175   :  { %v892_v34 = vmax.f32 %v815_v3, 0.0  ;;  %v727_v21 = vmul.f32 %v1304_v31, %v1770_v63  ;;  %v728_v7 = vmul.f32 %v1305_v43, %v1770_v63  ;;  %v958_v5 = vmax.f32 %v881_v22, 0.0  ;;  %v1308_v63 = vld [vmem:[#allocation2 + $0x180] sm:$0xff]  ;;  %v1309_v3 = vld [vmem:[#allocation2 + $0xc8] sm:$0xff] }
 0x176   :  { %986 = vmatpush.msra.mxu0 %v889_v59  ;;  %1012 = vmatpush.msra.mxu1 %v890_v53  ;;  %v949_v1 = vmax.f32 %v872_v44, 0.0  ;;  %v867_v47 = vadd.f32 %v1812_v20, %v735_v13  ;;  %v719_v11 = vmul.f32 %v1306_v62, %v1778_v6  ;;  %v950_v24 = vmax.f32 %v873_v40, 0.0  ;;  %v1314_v13 = vld [vmem:[#allocation2 + $0x100] sm:$0xff]  ;;  %v1976_v22 = vld [vmem:[%s2054_s3 + $0x8] sm:$0xff] }
 0x177   :  { %1038 = vmatpush.msra.mxu2 %v891_v35  ;;  %1064 = vmatpush.msra.mxu3 %v892_v34  ;;  %v858_v17 = vadd.f32 %v1862_v28, %v726_v58  ;;  %v720_v15 = vmul.f32 %v1307_v19, %v1778_v6  ;;  %v721_v56 = vmul.f32 %v1308_v63, %v1778_v6  ;;  %v951_v61 = vmax.f32 %v874_v54, 0.0  ;;  %v1317_v58 = vld [vmem:[#allocation2 + $0xd8] sm:$0xff] }
 0x178   :  { %987 = vmatpush.msra.mxu0 %v882_v25  ;;  %1013 = vmatpush.msra.mxu1 %v883_v51  ;;  %v942_v23 = vmax.f32 %v865_v38, 0.0  ;;  %v859_v20 = vadd.f32 %v1862_v28, %v727_v21  ;;  %v860_v0 = vadd.f32 %v1862_v28, %v728_v7  ;;  %v943_v10 = vmax.f32 %v866_v57, 0.0 }
 0x179   :  { %1039 = vmatpush.msra.mxu2 %v884_v52  ;;  %1065 = vmatpush.msra.mxu3 %v885_v50  ;;  %v851_v41 = vadd.f32 %v1806_v9, %v719_v11  ;;  %v698_v30 = vmul.f32 %v1309_v3, %v1790_v36  ;;  %v699_v59 = vmul.f32 %v1310_v27, %v1790_v36  ;;  %v944_v6 = vmax.f32 %v867_v47, 0.0  ;;  %v1315_v52 = vld [vmem:[#allocation2 + $0x108] sm:$0xff] }
 0x17a   :  { %1200 = vmatmul.msk.f32.vlgmr.msra.gmra.mxu2 %vm962_vm4, %v1941_v18  ;;  %1081 = vmatpush.msrb.mxu0 %v956_v46  ;;  %v852_v53 = vadd.f32 %v1806_v9, %v720_v15  ;;  %v853_v35 = vadd.f32 %v1806_v9, %v721_v56  ;;  %v712_v28 = vmul.f32 %v1311_v45, %v1774_v42  ;;  %v935_v34 = vmax.f32 %v858_v17, 0.0  ;;  %v1320_v17 = vld [vmem:[#allocation2 + $0xa0] sm:$0xff] }
 0x17b   :  { %1215 = vmatpush.msrb.mxu3 %v956_v46  ;;  %1107 = vmatpush.msrb.mxu1 %v957_v26  ;;  %v713_v49 = vmul.f32 %v1312_v37, %v1774_v42  ;;  %v714_v12 = vmul.f32 %v1313_v60, %v1774_v42  ;;  %v705_v25 = vmul.f32 %v1314_v13, %v1776_v29  ;;  %v936_v9 = vmax.f32 %v859_v20, 0.0  ;;  %v1316_v46 = vld [vmem:[#allocation2 + $0x110] sm:$0xff] }
 0x17c   :  { %1133 = vmatpush.msrb.mxu2 %v958_v5  ;;  %1082 = vmatpush.msrb.mxu0 %v949_v1  ;;  %v937_v51 = vmax.f32 %v860_v0, 0.0  ;;  %v844_v44 = vadd.f32 %v1826_v4, %v712_v28  ;;  %v706_v50 = vmul.f32 %v1315_v52, %v1776_v29  ;;  %v707_v54 = vmul.f32 %v1316_v46, %v1776_v29  ;;  %v1322_v0 = vld [vmem:[#allocation2 + $0x60] sm:$0xff]  ;;  %v1325_v28 = vld [vmem:[#allocation2 + $0x28] sm:$0xff] }
 0x17d   :  { %1216 = vmatpush.msrb.mxu3 %v949_v1  ;;  %1108 = vmatpush.msrb.mxu1 %v950_v24  ;;  %v845_v42 = vadd.f32 %v1826_v4, %v713_v49  ;;  %v846_v40 = vadd.f32 %v1826_v4, %v714_v12  ;;  %v928_v38 = vmax.f32 %v851_v41, 0.0  ;;  %v837_v32 = vadd.f32 %v1889_v55, %v705_v25  ;;  %v1318_v1 = vld [vmem:[#allocation2 + $0x90] sm:$0xff]  ;;  %v1323_v41 = vld [vmem:[#allocation2 + $0x20] sm:$0xff] }
 0x17e   :  { %1134 = vmatpush.msrb.mxu2 %v951_v61  ;;  %1083 = vmatpush.msrb.mxu0 %v942_v23  ;;  %v700_v26 = vmul.f32 %v1317_v58, %v1790_v36  ;;  %v929_v57 = vmax.f32 %v852_v53, 0.0  ;;  %v930_v31 = vmax.f32 %v853_v35, 0.0  ;;  %v838_v4 = vadd.f32 %v1889_v55, %v706_v50  ;;  %v1321_v61 = vld [vmem:[#allocation2 + $0x58] sm:$0xff]  ;;  %v961_v35 = vld [vmem:[%s2054_s3 + $0x10] sm:$0xff]  ;;  %s1383_s3 = smov [#allocation5]  }
 0x17f   :  { %1217 = vmatpush.msrb.mxu3 %v942_v23  ;;  %1109 = vmatpush.msrb.mxu1 %v943_v10  ;;  %v839_v29 = vadd.f32 %v1889_v55, %v707_v54  ;;  %v921_v21 = vmax.f32 %v844_v44, 0.0  ;;  %v830_v43 = vadd.f32 %v1860_v2, %v698_v30  ;;  %v922_v36 = vmax.f32 %v845_v42, 0.0  ;;  %v1319_v55 = vld [vmem:[#allocation2 + $0x98] sm:$0xff]  ;;  %v1326_v49 = vld [vmem:[#allocation2 + $0x30] sm:$0xff]  ;;  %s1179_s18 = sshll.u32 %s1383_s3, 4  ;;  %s1180_s18 = int_to_ptr.vmem [resolvable:$true] %s1179_s18 }
 0x180   :  { %1135 = vmatpush.msrb.mxu2 %v944_v6  ;;  %1197 = vmatmul.msk.f32.vlgmr.msra.gmra.mxu1 %vm962_vm4, %v1941_v18  ;;  %v923_v7 = vmax.f32 %v846_v40, 0.0  ;;  %v831_v5 = vadd.f32 %v1860_v2, %v699_v59  ;;  %v691_v47 = vmul.f32 %v1318_v1, %v1780_v16  ;;  %v914_v62 = vmax.f32 %v837_v32, 0.0  ;;  %v1324_v59 = vld [vmem:[#allocation2 + $0x68] sm:$0xff] }
 0x181   :  { %1084 = vmatpush.msrb.mxu0 %v935_v34  ;;  %1218 = vmatpush.msrb.mxu3 %v935_v34  ;;  %v832_v11 = vadd.f32 %v1860_v2, %v700_v26  ;;  %v692_v24 = vmul.f32 %v1319_v55, %v1780_v16  ;;  %v693_v19 = vmul.f32 %v1320_v17, %v1780_v16  ;;  %v915_v15 = vmax.f32 %v838_v4, 0.0 }
 0x182   :  { %1110 = vmatpush.msrb.mxu1 %v936_v9  ;;  %1136 = vmatpush.msrb.mxu2 %v937_v51  ;;  %v916_v63 = vmax.f32 %v839_v29, 0.0  ;;  %v823_v56 = vadd.f32 %v1876_v8, %v691_v47  ;;  %v684_v23 = vmul.f32 %v1321_v61, %v1782_v48  ;;  %v907_v20 = vmax.f32 %v830_v43, 0.0 }
 0x183   :  { %1201 = vmatmul.msk.f32.gmra.mxu2 %vm962_vm4, %v1976_v22  ;;  %1203 = vmatmul.msk.f32.vlgmr.msra.gmra.mxu3 %vm962_vm4, %v1941_v18  ;;  %v824_v2 = vadd.f32 %v1876_v8, %v692_v24  ;;  %v685_v10 = vmul.f32 %v1322_v0, %v1782_v48  ;;  %v677_v16 = vmul.f32 %v1323_v41, %v1896_v33  ;;  %v908_v3 = vmax.f32 %v831_v5, 0.0 }
 0x184   :  { %1085 = vmatpush.msrb.mxu0 %v928_v38  ;;  %1219 = vmatpush.msrb.mxu3 %v928_v38  ;;  %v825_v30 = vadd.f32 %v1876_v8, %v693_v19  ;;  %v816_v27 = vadd.f32 %v1918_v39, %v684_v23  ;;  %v686_v6 = vmul.f32 %v1324_v59, %v1782_v48  ;;  %v909_v53 = vmax.f32 %v832_v11, 0.0 }
 0x185   :  { %1111 = vmatpush.msrb.mxu1 %v929_v57  ;;  %1137 = vmatpush.msrb.mxu2 %v930_v31  ;;  %v817_v45 = vadd.f32 %v1918_v39, %v685_v10  ;;  %v678_v34 = vmul.f32 %v1325_v28, %v1896_v33  ;;  %v900_v8 = vmax.f32 %v823_v56, 0.0  ;;  %v809_v48 = vadd.f32 %v1904_v14, %v677_v16 }
 0x186   :  { %1086 = vmatpush.msrb.mxu0 %v921_v21  ;;  %1220 = vmatpush.msrb.mxu3 %v921_v21  ;;  %v818_v37 = vadd.f32 %v1918_v39, %v686_v6  ;;  %v679_v60 = vmul.f32 %v1326_v49, %v1896_v33  ;;  %v901_v12 = vmax.f32 %v824_v2, 0.0  ;;  %v902_v25 = vmax.f32 %v825_v30, 0.0 }
 0x187   :  { %1112 = vmatpush.msrb.mxu1 %v922_v36  ;;  %1138 = vmatpush.msrb.mxu2 %v923_v7  ;;  %v810_v13 = vadd.f32 %v1904_v14, %v678_v34  ;;  %v893_v9 = vmax.f32 %v816_v27, 0.0  ;;  %v894_v39 = vmax.f32 %v817_v45, 0.0  ;;  %v886_v44 = vmax.f32 %v809_v48, 0.0 }
 0x188   :  { %1087 = vmatpush.msrb.mxu0 %v914_v62  ;;  %1221 = vmatpush.msrb.mxu3 %v914_v62  ;;  %v811_v51 = vadd.f32 %v1904_v14, %v679_v60  ;;  %v895_v33 = vmax.f32 %v818_v37, 0.0 }
 0x189   :  { %1113 = vmatpush.msrb.mxu1 %v915_v15  ;;  %1139 = vmatpush.msrb.mxu2 %v916_v63  ;;  %v887_v52 = vmax.f32 %v810_v13, 0.0 }
 0x18a   :  { %1198 = vmatmul.msk.f32.gmra.mxu1 %vm962_vm4, %v1976_v22  ;;  %1088 = vmatpush.msrb.mxu0 %v907_v20  ;;  %v888_v50 = vmax.f32 %v811_v51, 0.0 }
 0x18b   :  { %1222 = vmatpush.msrb.mxu3 %v907_v20  ;;  %1114 = vmatpush.msrb.mxu1 %v908_v3 }
 0x18c   :  { %1140 = vmatpush.msrb.mxu2 %v909_v53  ;;  %1204 = vmatmul.msk.f32.gmra.mxu3 %vm962_vm4, %v1976_v22 }
 0x18d   :  { %1202 = vmatmul.msk.f32.gmra.mxu2 %vm962_vm4, %v961_v35  ;;  %1089 = vmatpush.msrb.mxu0 %v900_v8 }
 0x18e   :  { %1223 = vmatpush.msrb.mxu3 %v900_v8  ;;  %1115 = vmatpush.msrb.mxu1 %v901_v12 }
 0x18f   :  { %1141 = vmatpush.msrb.mxu2 %v902_v25  ;;  %1090 = vmatpush.msrb.mxu0 %v893_v9 }
 0x190   :  { %1224 = vmatpush.msrb.mxu3 %v893_v9  ;;  %1116 = vmatpush.msrb.mxu1 %v894_v39 }
 0x191   :  { %1142 = vmatpush.msrb.mxu2 %v895_v33  ;;  %1091 = vmatpush.msrb.mxu0 %v886_v44 }
 0x192   :  { %1225 = vmatpush.msrb.mxu3 %v886_v44  ;;  %1117 = vmatpush.msrb.mxu1 %v887_v52 }
 0x193   :  { %1143 = vmatpush.msrb.mxu2 %v888_v50  ;;  %1194 = vmatmul.msk.f32.vlgmr.msra.gmra.mxu0 %vm962_vm4, %v1941_v18 }
 0x194   :  { %1199 = vmatmul.msk.f32.gmra.mxu1 %vm962_vm4, %v961_v35  ;;  %1205 = vmatmul.msk.f32.gmra.mxu3 %vm962_vm4, %v961_v35 }
 0x195   :  { %1212 = vmatmul.msk.f32.vlgmr.msrb.gmra.mxu2 %vm962_vm4, %v1941_v18 }
 0x19b   :  { %1195 = vmatmul.msk.f32.gmra.mxu0 %vm962_vm4, %v1976_v22 }
 0x19c   :  { %1209 = vmatmul.msk.f32.vlgmr.msrb.gmra.mxu1 %vm962_vm4, %v1941_v18  ;;  %1207 = vmatmul.msk.f32.vlgmr.msrb.gmra.mxu3 %vm962_vm4, %v1976_v22 }
 0x19d   :  { %1213 = vmatmul.msk.f32.gmra.mxu2 %vm962_vm4, %v1976_v22 }
 0x1a3   :  { %1196 = vmatmul.msk.f32.gmra.mxu0 %vm962_vm4, %v961_v35 }
 0x1a4   :  { %1210 = vmatmul.msk.f32.gmra.mxu1 %vm962_vm4, %v1976_v22  ;;  %1208 = vmatmul.msk.f32.gmra.mxu3 %vm962_vm4, %v961_v35 }
 0x1a5   :  { %1214 = vmatmul.msk.f32.gmra.mxu2 %vm962_vm4, %v961_v35 }
 0x1ab   :  { %1206 = vmatmul.msk.f32.vlgmr.msrb.gmra.mxu0 %vm962_vm4, %v1941_v18 }
 0x1ac   :  { %1211 = vmatmul.msk.f32.gmra.mxu1 %vm962_vm4, %v961_v35 }
 0x1fd   :  { %v1015_v14 = vpop.f32.mrf.mxu1  ;;  %v1041_v42 = vpop.f32.mrf.mxu2 }
 0x1fe   :  { %1155 = vst [vmem:[#allocation5 + $0x8] sm:$0xff] %v1015_v14 }
 0x1ff   :  { %1156 = vst [vmem:[#allocation5 + $0x10] sm:$0xff] %v1041_v42 }
 0x206   :  { %v1044_v40 = vpop.f32.mrf.mxu2  ;;  %v1067_v46 = vpop.f32.mrf.mxu3 }
 0x207   :  { %v1018_v54 = vpop.f32.mrf.mxu1  ;;  %1163 = vst [vmem:[#allocation5 + $0x48] sm:$0xff] %v1044_v40 }
 0x208   :  { %1162 = vst [vmem:[#allocation5 + $0x40] sm:$0xff] %v1018_v54 }
 0x209   :  { %1157 = vst [vmem:[#allocation5 + $0x18] sm:$0xff] %v1067_v46 }
 0x20f   :  { %v1070_v22 = vpop.f32.mrf.mxu3 }
 0x210   :  { %v989_v38 = vpop.f32.mrf.mxu0  ;;  %v1047_v32 = vpop.f32.mrf.mxu2  ;;  %1164 = vst [vmem:[#allocation5 + $0x50] sm:$0xff] %v1070_v22 }
 0x211   :  { %1154 = vst [vmem:[#allocation5] sm:$0xff] %v989_v38  ;;  %v1021_v58 = vpop.f32.mrf.mxu1 }
 0x212   :  { %1169 = vst [vmem:[#allocation5 + $0x78] sm:$0xff] %v1021_v58 }
 0x213   :  { %1170 = vst [vmem:[#allocation5 + $0x80] sm:$0xff] %v1047_v32 }
 0x217   :  { %v1073_v18 = vpop.f32.mrf.mxu3 }
 0x218   :  { %v992_v26 = vpop.f32.mrf.mxu0  ;;  %1171 = vst [vmem:[#allocation5 + $0x88] sm:$0xff] %v1073_v18  ;;  %v1145_v57 = vpop.f32.mrf.mxu2 }
 0x219   :  { %1161 = vst [vmem:[#allocation5 + $0x38] sm:$0xff] %v992_v26  ;;  %v1119_v31 = vpop.f32.mrf.mxu1 }
 0x21a   :  { %1159 = vst [vmem:[#allocation5 + $0x28] sm:$0xff] %v1119_v31 }
 0x21b   :  { %1160 = vst.msk [vmem:[#allocation5 + $0x30] sm:$0xff] %vm116_vm0, %v1145_v57 }
 0x21f   :  { %v1096_v4 = vpop.f32.mrf.mxu3 }
 0x220   :  { %v995_v29 = vpop.f32.mrf.mxu0  ;;  %1165 = vst [vmem:[#allocation5 + $0x58] sm:$0xff] %v1096_v4  ;;  %v1148_v21 = vpop.f32.mrf.mxu2 }
 0x221   :  { %1168 = vst [vmem:[#allocation5 + $0x70] sm:$0xff] %v995_v29  ;;  %v1122_v43 = vpop.f32.mrf.mxu1 }
 0x222   :  { %1166 = vst [vmem:[#allocation5 + $0x60] sm:$0xff] %v1122_v43 }
 0x223   :  { %1167 = vst.msk [vmem:[#allocation5 + $0x68] sm:$0xff] %vm116_vm0, %v1148_v21 }
 0x227   :  { %v1099_v36 = vpop.f32.mrf.mxu3 }
 0x228   :  { %v1093_v7 = vpop.f32.mrf.mxu0  ;;  %1172 = vst [vmem:[#allocation5 + $0x90] sm:$0xff] %v1099_v36  ;;  %v1151_v5 = vpop.f32.mrf.mxu2 }
 0x229   :  { %1158 = vst [vmem:[#allocation5 + $0x20] sm:$0xff] %v1093_v7  ;;  %v1125_v1 = vpop.f32.mrf.mxu1 }
 0x22a   :  { %1173 = vst [vmem:[#allocation5 + $0x98] sm:$0xff] %v1125_v1 }
 0x22b   :  { %1174 = vst.msk [vmem:[#allocation5 + $0xa0] sm:$0xff] %vm116_vm0, %v1151_v5 }
 0x22c   :  { %1187 = dma.vmem_to_hbm [thread:$0]  %s1180_s18, 2688, %s1182_s22, [#allocation4], %s1380_s20, %s1380_s20, %s1381_s21  }
 0x22d   :  { %1377 = dma.done.wait [#allocation4], 2688  }
 0x22e   :  { %1378 = vsyncadd [#allocation4], 4294964608 }
 0x22f   :  { %1192 = vsyncpa [#allocation3], 1 }
 0x230   :  { %1193 = vsyncpa [#allocation4], 1 }

</bundles_post_ra>
